<compile_context>
chip_gen: v5e
topology: v5e:2x2
jax: 0.10.0
libtpu: 0.0.40
codegen_flags: <defaults>
</compile_context>

<pallas_src>
import math

import jax
import jax.numpy as jnp
from jax.experimental import pallas as pl
from jax.experimental.pallas import tpu as pltpu

# ---------------- model configuration (small, lane-dense) ----------------
EMBED_DIM = 128          # hparams['embedding_dim']  (pretrained vector size)
VALUE_DIM = 32           # hparams['value_dim']
HEAD_NUM = 4             # hparams['head_num']
HIDDEN = VALUE_DIM * HEAD_NUM          # 128
HEAD_DIM = HIDDEN // HEAD_NUM          # 32
QUERY_DIM = 128          # hparams['query_dim']
LEVEL = 1                # MHA_Encoder.level
SEQ = 16                 # signal_length
VOCAB = 100


# ---------------- Pallas kernel: fused MHA encoder forward ----------------
def mha_encoder_kernel(ids_ref, tbl_ref, w_qkv_ref, b_qkv_ref,
                       w_op_ref, b_op_ref, qv_ref,
                       emb_ref, repr_ref):
    tb, S = ids_ref.shape
    V, E = tbl_ref.shape
    H = HIDDEN
    QD = qv_ref.shape[-1]
    M = tb * S

    # 1) embedding gather fused as an exact one-hot matmul (row i of tbl for id i).
    # TODO(synk): for a realistic large vocab the table won't fit VMEM; keep it in
    # HBM (memory_space=pl.ANY) and DMA-gather rows with scalar-prefetched ids.
    ids = ids_ref[...]                                                   # (tb, S) int32
    onehot = (ids[:, :, None] ==
              jax.lax.broadcasted_iota(jnp.int32, (tb, S, V), 2)).astype(jnp.bfloat16)
    x2d = jnp.dot(onehot.reshape(M, V), tbl_ref[...],
                  preferred_element_type=jnp.float32).astype(jnp.bfloat16)   # (M, E)

    # 2) fused (queryProject∘q_proj | k_proj | v_proj): one (M,E)@(E,3H) matmul.
    qkv = jnp.dot(x2d, w_qkv_ref[...],
                  preferred_element_type=jnp.float32) + b_qkv_ref[...]       # (M, 3H) f32
    q = (qkv[:, :H] * (1.0 / math.sqrt(HEAD_DIM))).reshape(tb, S, H).astype(jnp.bfloat16)
    k = qkv[:, H:2 * H].reshape(tb, S, H).astype(jnp.bfloat16)
    v = qkv[:, 2 * H:].reshape(tb, S, H).astype(jnp.bfloat16)

    # 3) per-head attention; ctx assembled with a lane concat (no VMEM scratch,
    #    no masked slice-stores). At large tb this rides as VPU/XLU/EUP filler
    #    while the big QKV / out-proj matmuls bind the MXU.
    ctx_heads = []
    for h in range(HEAD_NUM):
        sl = slice(h * HEAD_DIM, (h + 1) * HEAD_DIM)
        s = jnp.einsum("bqd,bkd->bqk", q[:, :, sl], k[:, :, sl],
                       preferred_element_type=jnp.float32)                   # (tb, S, S)
        s = s - jnp.max(s, axis=-1, keepdims=True)
        p = jnp.exp(s)
        p = p * pl.reciprocal(jnp.sum(p, axis=-1, keepdims=True), approx=True)
        ctx_heads.append(
            jnp.einsum("bqk,bkd->bqd", p.astype(jnp.bfloat16), v[:, :, sl],
                       preferred_element_type=jnp.float32).astype(jnp.bfloat16))
    ctx2d = jnp.concatenate(ctx_heads, axis=-1).reshape(M, H)                # (M, H) bf16

    # 4) packed (out_proj | out_proj∘keyProject): one (M,H)@(H,H+QD) matmul, N=256.
    proj = jnp.dot(ctx2d, w_op_ref[...],
                   preferred_element_type=jnp.float32) + b_op_ref[...]       # (M, H+QD) f32
    attn = proj[:, :H]                      # f32 MHA output == news_embedding
    mk = jnp.tanh(proj[:, H:])              # f32 keyProject + tanh

    emb_ref[...] = attn.reshape(tb, S, H).astype(emb_ref.dtype)              # bf16 out

    # 5) learned-query pooling (scaled dot-product attention over S), f32.
    attn3 = attn.reshape(tb, S, H)
    mk3 = mk.reshape(tb, S, QD)
    qv = qv_ref[...].reshape(1, 1, QD)
    logits = jnp.sum(mk3 * qv, axis=-1, keepdims=True) * (1.0 / math.sqrt(QD))  # (tb,S,1)
    logits = logits - jnp.max(logits, axis=1, keepdims=True)
    w = jnp.exp(logits)
    w = w * pl.reciprocal(jnp.sum(w, axis=1, keepdims=True), approx=True)
    repr_ref[...] = jnp.sum(w * attn3, axis=1, keepdims=True)                # (tb, 1, H)


def _mha_pallas(ids, kp, tb):
    """ids: (B_pad, S) int32 token ids (B_pad % tb == 0); kp: packed kernel params."""
    Bp, S = ids.shape
    V, E = kp["emb_tbl"].shape
    H, QD = HIDDEN, QUERY_DIM
    M = Bp * S

    def rep(shape):  # full-array (grid-invariant) block
        nd = len(shape)
        return pl.BlockSpec(shape, lambda b, _nd=nd: (0,) * _nd)

    in_specs = [
        pl.BlockSpec((tb, S), lambda b: (b, 0)),        # token ids (tiny HBM stream)
        rep((V, E)),                                    # bf16 embedding table
        rep((E, 3 * H)), rep((1, 3 * H)),               # fused qkv weight / bias
        rep((H, H + QD)), rep((1, H + QD)),             # packed out-proj | keyProject
        rep((1, QD)),                                   # learned global query
    ]
    out_specs = [
        pl.BlockSpec((tb, S, H), lambda b: (b, 0, 0)),  # news_embedding (bf16)
        pl.BlockSpec((tb, 1, H), lambda b: (b, 0, 0)),  # news_repr (f32)
    ]
    out_shape = (jax.ShapeDtypeStruct((Bp, S, H), jnp.bfloat16),
                 jax.ShapeDtypeStruct((Bp, 1, H), jnp.float32))

    flops = (2 * M * (V * E + E * 3 * H + H * (H + QD))
             + 4 * Bp * HEAD_NUM * S * S * HEAD_DIM)
    transcendentals = Bp * HEAD_NUM * S * S + M * QD + Bp * S
    bytes_accessed = (4 * M                                   # ids
                      + 2 * V * E                             # table
                      + 2 * (E * 3 * H + H * (H + QD))        # bf16 weights
                      + 4 * (3 * H + H + 2 * QD)              # f32 biases + query
                      + 2 * M * H + 4 * Bp * H)               # outputs

    return pl.pallas_call(
        mha_encoder_kernel,
        out_shape=out_shape,
        grid_spec=pltpu.PrefetchScalarGridSpec(
            num_scalar_prefetch=0,
            grid=(Bp // tb,),
            in_specs=in_specs,
            out_specs=out_specs,
        ),
        compiler_params=pltpu.CompilerParams(
            dimension_semantics=("parallel",),
            vmem_limit_bytes=48 * 1024 * 1024,   # > v5e 16MiB default, < v7x 64MiB phys
        ),
        cost_estimate=pl.CostEstimate(flops=flops,
                                      transcendentals=transcendentals,
                                      bytes_accessed=bytes_accessed),
    )(ids, kp["emb_tbl"], kp["w_qkv"], kp["b_qkv"],
      kp["w_op"], kp["b_op"], kp["query"])


# ---------------- parameter handling ----------------
def init_params(key):
    ks = jax.random.split(key, 14)
    n = lambda k, shape, s: s * jax.random.normal(k, shape, dtype=jnp.float32)
    return {
        "emb":  n(ks[0], (VOCAB, EMBED_DIM), 0.5),           # pretrained vocab.vectors
        "A_qp": n(ks[1], (EMBED_DIM, HIDDEN), 0.06), "b_qp": n(ks[2], (1, HIDDEN), 0.06),
        "A_q":  n(ks[3], (HIDDEN, HIDDEN), 0.06),    "b_q":  n(ks[4], (1, HIDDEN), 0.06),
        "A_k":  n(ks[5], (EMBED_DIM, HIDDEN), 0.06), "b_k":  n(ks[6], (1, HIDDEN), 0.06),
        "A_v":  n(ks[7], (EMBED_DIM, HIDDEN), 0.06), "b_v":  n(ks[8], (1, HIDDEN), 0.06),
        "A_o":  n(ks[9], (HIDDEN, HIDDEN), 0.06),    "b_o":  n(ks[10], (1, HIDDEN), 0.06),
        "A_kp": n(ks[11], (HIDDEN, QUERY_DIM), 0.06), "b_kp": n(ks[12], (1, QUERY_DIM), 0.06),
        "query": n(ks[13], (1, QUERY_DIM), 1.0),
    }


def pack_kernel_params(p):
    # fold queryProject into the MHA q-projection (exact linear composition),
    # pack q/k/v into one lane-dense (E, 3H) weight, and fold keyProject into the
    # out-projection:  attn = ctx@A_o + b_o ;  mk_in = attn@A_kp + b_kp
    #               => [attn | mk_in] = ctx@[A_o | A_o@A_kp] + [b_o | b_o@A_kp + b_kp].
    # Compositions are done in f32, weights cast to bf16; biases stay f32.
    a_qc = p["A_qp"] @ p["A_q"]
    b_qc = p["b_qp"] @ p["A_q"] + p["b_q"]
    w_qkv = jnp.concatenate([a_qc, p["A_k"], p["A_v"]], axis=1)
    b_qkv = jnp.concatenate([b_qc, p["b_k"], p["b_v"]], axis=1)
    w_op = jnp.concatenate([p["A_o"], p["A_o"] @ p["A_kp"]], axis=1)
    b_op = jnp.concatenate([p["b_o"], p["b_o"] @ p["A_kp"] + p["b_kp"]], axis=1)
    return {
        "emb_tbl": p["emb"].astype(jnp.bfloat16),
        "w_qkv": w_qkv.astype(jnp.bfloat16), "b_qkv": b_qkv,
        "w_op": w_op.astype(jnp.bfloat16), "b_op": b_op,
        "query": p["query"],
    }


# ---------------- MHA_Encoder.forward equivalent ----------------
def mha_encoder_forward(params, news_batch, tb=256):
    """news_batch: [batch, news_num, seq] int32 token ids.
       returns (news_embedding [batch, news_num, seq, LEVEL, HIDDEN] bf16,
                news_repr      [batch, news_num, HIDDEN]             f32)"""
    bs, nn_, sl_ = news_batch.shape
    B = bs * nn_
    ids = news_batch.reshape(B, sl_).astype(jnp.int32)

    # Pick the per-step batch tile: never fall back to tb=1; pad B instead.
    # (On v7x, pick tb <= B//2 for large B so both TensorCores get grid steps.)
    tb_eff = min(tb, B)
    if tb_eff < B:
        tb_eff = max(8, (tb_eff // 8) * 8)        # keep sublane-friendly block rows
    B_pad = -(-B // tb_eff) * tb_eff
    if B_pad != B:
        ids = jnp.pad(ids, ((0, B_pad - B), (0, 0)))   # pad rows use token id 0

    kp = pack_kernel_params(params)
    emb_out, repr_out = _mha_pallas(ids, kp, tb_eff)
    emb_out = emb_out[:B]
    repr_out = repr_out[:B]
    news_embedding = emb_out.reshape(bs, nn_, sl_, LEVEL, HIDDEN)
    news_repr = repr_out.reshape(bs, nn_, HIDDEN)
    return news_embedding, news_repr


# ---------------- pure-JAX f32 reference (faithful, unfused) ----------------
def reference_forward(p, news_batch):
    bs, nn_, sl_ = news_batch.shape
    ids = news_batch.reshape(-1, sl_)
    x = p["emb"][ids]                                        # (B, S, E)
    q_in = x @ p["A_qp"] + p["b_qp"]                         # queryProject
    q = q_in @ p["A_q"] + p["b_q"]
    k = x @ p["A_k"] + p["b_k"]
    v = x @ p["A_v"] + p["b_v"]
    B = x.shape[0]

    def split(t):
        return t.reshape(B, sl_, HEAD_NUM, HEAD_DIM).transpose(0, 2, 1, 3)

    qh, kh, vh = split(q), split(k), split(v)
    scores = jnp.einsum("bhqd,bhkd->bhqk", qh, kh) / math.sqrt(HEAD_DIM)
    attn = jax.nn.softmax(scores, axis=-1)
    ctx = jnp.einsum("bhqk,bhkd->bhqd", attn, vh).transpose(0, 2, 1, 3).reshape(B, sl_, HIDDEN)
    emb_out = ctx @ p["A_o"] + p["b_o"]                      # news_embedding
    mk = jnp.tanh(emb_out @ p["A_kp"] + p["b_kp"])
    logits = jnp.einsum("bsq,uq->bus", mk, p["query"]) / math.sqrt(QUERY_DIM)  # (B,1,S)
    w = jax.nn.softmax(logits, axis=-1)
    repr_ = jnp.einsum("bus,bsh->buh", w, emb_out)[:, 0, :]
    return (emb_out.reshape(bs, nn_, sl_, LEVEL, HIDDEN),
            repr_.reshape(bs, nn_, HIDDEN))


if __name__ == "__main__":
    key = jax.random.PRNGKey(0)
    kp_key, kt_key = jax.random.split(key)
    params = init_params(kp_key)

    batch, news_num = 2, 2
    news_batch = jax.random.randint(kt_key, (batch, news_num, SEQ), 0, VOCAB,
                                    dtype=jnp.int32)

    news_embedding, news_repr = mha_encoder_forward(params, news_batch)
    jax.block_until_ready((news_embedding, news_repr))

    assert news_embedding.shape == (batch, news_num, SEQ, LEVEL, HIDDEN)
    assert news_repr.shape == (batch, news_num, HIDDEN)

    ref_emb, ref_repr = reference_forward(params, news_batch)
    err_emb = float(jnp.max(jnp.abs(news_embedding.astype(jnp.float32) - ref_emb)))
    err_repr = float(jnp.max(jnp.abs(news_repr - ref_repr)))
    assert err_emb < 3e-2 and err_repr < 3e-2, (err_emb, err_repr)

    print("KERNEL_OK")
</pallas_src>

<mosaic_0001>
module attributes {stable_mosaic.version = 11 : i64} {
  func.func @mha_encoder_kernel(%arg0: i32, %arg1: memref<4x16xi32, #tpu.memory_space<vmem>>, %arg2: memref<100x128xbf16, #tpu.memory_space<vmem>>, %arg3: memref<128x384xbf16, #tpu.memory_space<vmem>>, %arg4: memref<1x384xf32, #tpu.memory_space<vmem>>, %arg5: memref<128x256xbf16, #tpu.memory_space<vmem>>, %arg6: memref<1x256xf32, #tpu.memory_space<vmem>>, %arg7: memref<1x128xf32, #tpu.memory_space<vmem>>, %arg8: memref<4x16x128xbf16, #tpu.memory_space<vmem>>, %arg9: memref<4x1x128xf32, #tpu.memory_space<vmem>>) attributes {dimension_semantics = [#tpu.dimension_semantics<parallel>], iteration_bounds = array<i64: 1>, scalar_prefetch = 0 : i64, scratch_operands = 0 : i64, tpu.core_type = #tpu.core_type<tc>, window_params = [{transform_indices = @transform_0, window_bounds = array<i64: 4, 16>}, {pipeline_mode = #tpu.pipeline_mode<synchronous>, transform_indices = @transform_1, window_bounds = array<i64: 100, 128>}, {pipeline_mode = #tpu.pipeline_mode<synchronous>, transform_indices = @transform_2, window_bounds = array<i64: 128, 384>}, {pipeline_mode = #tpu.pipeline_mode<synchronous>, transform_indices = @transform_3, window_bounds = array<i64: 1, 384>}, {pipeline_mode = #tpu.pipeline_mode<synchronous>, transform_indices = @transform_4, window_bounds = array<i64: 128, 256>}, {pipeline_mode = #tpu.pipeline_mode<synchronous>, transform_indices = @transform_5, window_bounds = array<i64: 1, 256>}, {pipeline_mode = #tpu.pipeline_mode<synchronous>, transform_indices = @transform_6, window_bounds = array<i64: 1, 128>}, {transform_indices = @transform_7, window_bounds = array<i64: 4, 16, 128>}, {transform_indices = @transform_8, window_bounds = array<i64: 4, 1, 128>}]} {
    %c0 = arith.constant 0 : index
    %c0_0 = arith.constant 0 : index
    %0 = vector.load %arg1[%c0, %c0_0] : memref<4x16xi32, #tpu.memory_space<vmem>>, vector<4x16xi32>
    %1 = vector.shape_cast %0 : vector<4x16xi32> to vector<4x16x1xi32>
    %2 = tpu.iota {dimensions = array<i32: 2>} : vector<4x16x100xi32>
    %3 = vector.broadcast %1 : vector<4x16x1xi32> to vector<4x16x100xi32>
    %4 = arith.cmpi eq, %3, %2 : vector<4x16x100xi32>
    %5 = arith.extui %4 : vector<4x16x100xi1> to vector<4x16x100xi32>
    %6 = arith.sitofp %5 : vector<4x16x100xi32> to vector<4x16x100xf32>
    %7 = arith.truncf %6 : vector<4x16x100xf32> to vector<4x16x100xbf16>
    %8 = vector.shape_cast %7 : vector<4x16x100xbf16> to vector<64x100xbf16>
    %c0_1 = arith.constant 0 : index
    %c0_2 = arith.constant 0 : index
    %9 = vector.load %arg2[%c0_1, %c0_2] : memref<100x128xbf16, #tpu.memory_space<vmem>>, vector<100x128xbf16>
    %cst = arith.constant dense<0.000000e+00> : vector<64x128xf32>
    %10 = tpu.matmul %8, %9, %cst {dimension_numbers = #tpu.dot_dimension_numbers<[1], [0], [0], [1], [0, 0, 1, 1], [], []>} : vector<64x100xbf16>, vector<100x128xbf16>, vector<64x128xf32> -> vector<64x128xf32>
    %11 = arith.truncf %10 : vector<64x128xf32> to vector<64x128xbf16>
    %c0_3 = arith.constant 0 : index
    %c0_4 = arith.constant 0 : index
    %12 = vector.load %arg3[%c0_3, %c0_4] : memref<128x384xbf16, #tpu.memory_space<vmem>>, vector<128x384xbf16>
    %cst_5 = arith.constant dense<0.000000e+00> : vector<64x384xf32>
    %13 = tpu.matmul %11, %12, %cst_5 {dimension_numbers = #tpu.dot_dimension_numbers<[1], [0], [0], [1], [0, 0, 1, 1], [], []>} : vector<64x128xbf16>, vector<128x384xbf16>, vector<64x384xf32> -> vector<64x384xf32>
    %c0_6 = arith.constant 0 : index
    %c0_7 = arith.constant 0 : index
    %14 = vector.load %arg4[%c0_6, %c0_7] : memref<1x384xf32, #tpu.memory_space<vmem>>, vector<1x384xf32>
    %15 = vector.broadcast %14 : vector<1x384xf32> to vector<64x384xf32>
    %16 = arith.addf %13, %15 : vector<64x384xf32>
    %17 = vector.extract_strided_slice %16 {offsets = [0, 0], sizes = [64, 128], strides = [1, 1]} : vector<64x384xf32> to vector<64x128xf32>
    %cst_8 = arith.constant 0.176776692 : f32
    %18 = vector.broadcast %cst_8 : f32 to vector<64x128xf32>
    %19 = arith.mulf %17, %18 : vector<64x128xf32>
    %20 = vector.shape_cast %19 : vector<64x128xf32> to vector<4x16x128xf32>
    %21 = arith.truncf %20 : vector<4x16x128xf32> to vector<4x16x128xbf16>
    %22 = vector.extract_strided_slice %16 {offsets = [0, 128], sizes = [64, 128], strides = [1, 1]} : vector<64x384xf32> to vector<64x128xf32>
    %23 = vector.shape_cast %22 : vector<64x128xf32> to vector<4x16x128xf32>
    %24 = arith.truncf %23 : vector<4x16x128xf32> to vector<4x16x128xbf16>
    %25 = vector.extract_strided_slice %16 {offsets = [0, 256], sizes = [64, 128], strides = [1, 1]} : vector<64x384xf32> to vector<64x128xf32>
    %26 = vector.shape_cast %25 : vector<64x128xf32> to vector<4x16x128xf32>
    %27 = arith.truncf %26 : vector<4x16x128xf32> to vector<4x16x128xbf16>
    %28 = vector.extract_strided_slice %21 {offsets = [0, 0, 0], sizes = [4, 16, 32], strides = [1, 1, 1]} : vector<4x16x128xbf16> to vector<4x16x32xbf16>
    %29 = vector.extract_strided_slice %24 {offsets = [0, 0, 0], sizes = [4, 16, 32], strides = [1, 1, 1]} : vector<4x16x128xbf16> to vector<4x16x32xbf16>
    "tpu.trace_start"() <{level = 10 : i32, message = "bqd,bkd->bqk"}> : () -> ()
    %cst_9 = arith.constant dense<0.000000e+00> : vector<4x16x16xf32>
    %30 = tpu.matmul %28, %29, %cst_9 {dimension_numbers = #tpu.dot_dimension_numbers<[2], [2], [1], [1], [0, 0, 0, 1, 1, 1], [0], [0]>} : vector<4x16x32xbf16>, vector<4x16x32xbf16>, vector<4x16x16xf32> -> vector<4x16x16xf32>
    "tpu.trace_stop"() : () -> ()
    %cst_10 = arith.constant dense<0xFF800000> : vector<4x16xf32>
    %31 = vector.multi_reduction <maximumf>, %30, %cst_10 [2] : vector<4x16x16xf32> to vector<4x16xf32>
    %32 = vector.shape_cast %31 : vector<4x16xf32> to vector<4x16x1xf32>
    %33 = vector.broadcast %32 : vector<4x16x1xf32> to vector<4x16x16xf32>
    %34 = arith.subf %30, %33 : vector<4x16x16xf32>
    %35 = math.exp %34 : vector<4x16x16xf32>
    %cst_11 = arith.constant dense<0.000000e+00> : vector<4x16xf32>
    %36 = vector.multi_reduction <add>, %35, %cst_11 [2] : vector<4x16x16xf32> to vector<4x16xf32>
    %37 = vector.shape_cast %36 : vector<4x16xf32> to vector<4x16x1xf32>
    %38 = tpu.reciprocal %37 {approx = true} : vector<4x16x1xf32> -> vector<4x16x1xf32>
    %39 = vector.broadcast %38 : vector<4x16x1xf32> to vector<4x16x16xf32>
    %40 = arith.mulf %35, %39 : vector<4x16x16xf32>
    %41 = arith.truncf %40 : vector<4x16x16xf32> to vector<4x16x16xbf16>
    %42 = vector.extract_strided_slice %27 {offsets = [0, 0, 0], sizes = [4, 16, 32], strides = [1, 1, 1]} : vector<4x16x128xbf16> to vector<4x16x32xbf16>
    "tpu.trace_start"() <{level = 10 : i32, message = "bqk,bkd->bqd"}> : () -> ()
    %cst_12 = arith.constant dense<0.000000e+00> : vector<4x16x32xf32>
    %43 = tpu.matmul %41, %42, %cst_12 {dimension_numbers = #tpu.dot_dimension_numbers<[2], [1], [1], [2], [0, 0, 0, 1, 1, 2], [0], [0]>} : vector<4x16x16xbf16>, vector<4x16x32xbf16>, vector<4x16x32xf32> -> vector<4x16x32xf32>
    "tpu.trace_stop"() : () -> ()
    %44 = arith.truncf %43 : vector<4x16x32xf32> to vector<4x16x32xbf16>
    %45 = vector.extract_strided_slice %21 {offsets = [0, 0, 32], sizes = [4, 16, 32], strides = [1, 1, 1]} : vector<4x16x128xbf16> to vector<4x16x32xbf16>
    %46 = vector.extract_strided_slice %24 {offsets = [0, 0, 32], sizes = [4, 16, 32], strides = [1, 1, 1]} : vector<4x16x128xbf16> to vector<4x16x32xbf16>
    "tpu.trace_start"() <{level = 10 : i32, message = "bqd,bkd->bqk"}> : () -> ()
    %cst_13 = arith.constant dense<0.000000e+00> : vector<4x16x16xf32>
    %47 = tpu.matmul %45, %46, %cst_13 {dimension_numbers = #tpu.dot_dimension_numbers<[2], [2], [1], [1], [0, 0, 0, 1, 1, 1], [0], [0]>} : vector<4x16x32xbf16>, vector<4x16x32xbf16>, vector<4x16x16xf32> -> vector<4x16x16xf32>
    "tpu.trace_stop"() : () -> ()
    %cst_14 = arith.constant dense<0xFF800000> : vector<4x16xf32>
    %48 = vector.multi_reduction <maximumf>, %47, %cst_14 [2] : vector<4x16x16xf32> to vector<4x16xf32>
    %49 = vector.shape_cast %48 : vector<4x16xf32> to vector<4x16x1xf32>
    %50 = vector.broadcast %49 : vector<4x16x1xf32> to vector<4x16x16xf32>
    %51 = arith.subf %47, %50 : vector<4x16x16xf32>
    %52 = math.exp %51 : vector<4x16x16xf32>
    %cst_15 = arith.constant dense<0.000000e+00> : vector<4x16xf32>
    %53 = vector.multi_reduction <add>, %52, %cst_15 [2] : vector<4x16x16xf32> to vector<4x16xf32>
    %54 = vector.shape_cast %53 : vector<4x16xf32> to vector<4x16x1xf32>
    %55 = tpu.reciprocal %54 {approx = true} : vector<4x16x1xf32> -> vector<4x16x1xf32>
    %56 = vector.broadcast %55 : vector<4x16x1xf32> to vector<4x16x16xf32>
    %57 = arith.mulf %52, %56 : vector<4x16x16xf32>
    %58 = arith.truncf %57 : vector<4x16x16xf32> to vector<4x16x16xbf16>
    %59 = vector.extract_strided_slice %27 {offsets = [0, 0, 32], sizes = [4, 16, 32], strides = [1, 1, 1]} : vector<4x16x128xbf16> to vector<4x16x32xbf16>
    "tpu.trace_start"() <{level = 10 : i32, message = "bqk,bkd->bqd"}> : () -> ()
    %cst_16 = arith.constant dense<0.000000e+00> : vector<4x16x32xf32>
    %60 = tpu.matmul %58, %59, %cst_16 {dimension_numbers = #tpu.dot_dimension_numbers<[2], [1], [1], [2], [0, 0, 0, 1, 1, 2], [0], [0]>} : vector<4x16x16xbf16>, vector<4x16x32xbf16>, vector<4x16x32xf32> -> vector<4x16x32xf32>
    "tpu.trace_stop"() : () -> ()
    %61 = arith.truncf %60 : vector<4x16x32xf32> to vector<4x16x32xbf16>
    %62 = vector.extract_strided_slice %21 {offsets = [0, 0, 64], sizes = [4, 16, 32], strides = [1, 1, 1]} : vector<4x16x128xbf16> to vector<4x16x32xbf16>
    %63 = vector.extract_strided_slice %24 {offsets = [0, 0, 64], sizes = [4, 16, 32], strides = [1, 1, 1]} : vector<4x16x128xbf16> to vector<4x16x32xbf16>
    "tpu.trace_start"() <{level = 10 : i32, message = "bqd,bkd->bqk"}> : () -> ()
    %cst_17 = arith.constant dense<0.000000e+00> : vector<4x16x16xf32>
    %64 = tpu.matmul %62, %63, %cst_17 {dimension_numbers = #tpu.dot_dimension_numbers<[2], [2], [1], [1], [0, 0, 0, 1, 1, 1], [0], [0]>} : vector<4x16x32xbf16>, vector<4x16x32xbf16>, vector<4x16x16xf32> -> vector<4x16x16xf32>
    "tpu.trace_stop"() : () -> ()
    %cst_18 = arith.constant dense<0xFF800000> : vector<4x16xf32>
    %65 = vector.multi_reduction <maximumf>, %64, %cst_18 [2] : vector<4x16x16xf32> to vector<4x16xf32>
    %66 = vector.shape_cast %65 : vector<4x16xf32> to vector<4x16x1xf32>
    %67 = vector.broadcast %66 : vector<4x16x1xf32> to vector<4x16x16xf32>
    %68 = arith.subf %64, %67 : vector<4x16x16xf32>
    %69 = math.exp %68 : vector<4x16x16xf32>
    %cst_19 = arith.constant dense<0.000000e+00> : vector<4x16xf32>
    %70 = vector.multi_reduction <add>, %69, %cst_19 [2] : vector<4x16x16xf32> to vector<4x16xf32>
    %71 = vector.shape_cast %70 : vector<4x16xf32> to vector<4x16x1xf32>
    %72 = tpu.reciprocal %71 {approx = true} : vector<4x16x1xf32> -> vector<4x16x1xf32>
    %73 = vector.broadcast %72 : vector<4x16x1xf32> to vector<4x16x16xf32>
    %74 = arith.mulf %69, %73 : vector<4x16x16xf32>
    %75 = arith.truncf %74 : vector<4x16x16xf32> to vector<4x16x16xbf16>
    %76 = vector.extract_strided_slice %27 {offsets = [0, 0, 64], sizes = [4, 16, 32], strides = [1, 1, 1]} : vector<4x16x128xbf16> to vector<4x16x32xbf16>
    "tpu.trace_start"() <{level = 10 : i32, message = "bqk,bkd->bqd"}> : () -> ()
    %cst_20 = arith.constant dense<0.000000e+00> : vector<4x16x32xf32>
    %77 = tpu.matmul %75, %76, %cst_20 {dimension_numbers = #tpu.dot_dimension_numbers<[2], [1], [1], [2], [0, 0, 0, 1, 1, 2], [0], [0]>} : vector<4x16x16xbf16>, vector<4x16x32xbf16>, vector<4x16x32xf32> -> vector<4x16x32xf32>
    "tpu.trace_stop"() : () -> ()
    %78 = arith.truncf %77 : vector<4x16x32xf32> to vector<4x16x32xbf16>
    %79 = vector.extract_strided_slice %21 {offsets = [0, 0, 96], sizes = [4, 16, 32], strides = [1, 1, 1]} : vector<4x16x128xbf16> to vector<4x16x32xbf16>
    %80 = vector.extract_strided_slice %24 {offsets = [0, 0, 96], sizes = [4, 16, 32], strides = [1, 1, 1]} : vector<4x16x128xbf16> to vector<4x16x32xbf16>
    "tpu.trace_start"() <{level = 10 : i32, message = "bqd,bkd->bqk"}> : () -> ()
    %cst_21 = arith.constant dense<0.000000e+00> : vector<4x16x16xf32>
    %81 = tpu.matmul %79, %80, %cst_21 {dimension_numbers = #tpu.dot_dimension_numbers<[2], [2], [1], [1], [0, 0, 0, 1, 1, 1], [0], [0]>} : vector<4x16x32xbf16>, vector<4x16x32xbf16>, vector<4x16x16xf32> -> vector<4x16x16xf32>
    "tpu.trace_stop"() : () -> ()
    %cst_22 = arith.constant dense<0xFF800000> : vector<4x16xf32>
    %82 = vector.multi_reduction <maximumf>, %81, %cst_22 [2] : vector<4x16x16xf32> to vector<4x16xf32>
    %83 = vector.shape_cast %82 : vector<4x16xf32> to vector<4x16x1xf32>
    %84 = vector.broadcast %83 : vector<4x16x1xf32> to vector<4x16x16xf32>
    %85 = arith.subf %81, %84 : vector<4x16x16xf32>
    %86 = math.exp %85 : vector<4x16x16xf32>
    %cst_23 = arith.constant dense<0.000000e+00> : vector<4x16xf32>
    %87 = vector.multi_reduction <add>, %86, %cst_23 [2] : vector<4x16x16xf32> to vector<4x16xf32>
    %88 = vector.shape_cast %87 : vector<4x16xf32> to vector<4x16x1xf32>
    %89 = tpu.reciprocal %88 {approx = true} : vector<4x16x1xf32> -> vector<4x16x1xf32>
    %90 = vector.broadcast %89 : vector<4x16x1xf32> to vector<4x16x16xf32>
    %91 = arith.mulf %86, %90 : vector<4x16x16xf32>
    %92 = arith.truncf %91 : vector<4x16x16xf32> to vector<4x16x16xbf16>
    %93 = vector.extract_strided_slice %27 {offsets = [0, 0, 96], sizes = [4, 16, 32], strides = [1, 1, 1]} : vector<4x16x128xbf16> to vector<4x16x32xbf16>
    "tpu.trace_start"() <{level = 10 : i32, message = "bqk,bkd->bqd"}> : () -> ()
    %cst_24 = arith.constant dense<0.000000e+00> : vector<4x16x32xf32>
    %94 = tpu.matmul %92, %93, %cst_24 {dimension_numbers = #tpu.dot_dimension_numbers<[2], [1], [1], [2], [0, 0, 0, 1, 1, 2], [0], [0]>} : vector<4x16x16xbf16>, vector<4x16x32xbf16>, vector<4x16x32xf32> -> vector<4x16x32xf32>
    "tpu.trace_stop"() : () -> ()
    %95 = arith.truncf %94 : vector<4x16x32xf32> to vector<4x16x32xbf16>
    %96 = tpu.concatenate %44, %61, %78, %95 in 2 : vector<4x16x32xbf16>, vector<4x16x32xbf16>, vector<4x16x32xbf16>, vector<4x16x32xbf16> -> vector<4x16x128xbf16>
    %97 = vector.shape_cast %96 : vector<4x16x128xbf16> to vector<64x128xbf16>
    %c0_25 = arith.constant 0 : index
    %c0_26 = arith.constant 0 : index
    %98 = vector.load %arg5[%c0_25, %c0_26] : memref<128x256xbf16, #tpu.memory_space<vmem>>, vector<128x256xbf16>
    %cst_27 = arith.constant dense<0.000000e+00> : vector<64x256xf32>
    %99 = tpu.matmul %97, %98, %cst_27 {dimension_numbers = #tpu.dot_dimension_numbers<[1], [0], [0], [1], [0, 0, 1, 1], [], []>} : vector<64x128xbf16>, vector<128x256xbf16>, vector<64x256xf32> -> vector<64x256xf32>
    %c0_28 = arith.constant 0 : index
    %c0_29 = arith.constant 0 : index
    %100 = vector.load %arg6[%c0_28, %c0_29] : memref<1x256xf32, #tpu.memory_space<vmem>>, vector<1x256xf32>
    %101 = vector.broadcast %100 : vector<1x256xf32> to vector<64x256xf32>
    %102 = arith.addf %99, %101 : vector<64x256xf32>
    %103 = vector.extract_strided_slice %102 {offsets = [0, 0], sizes = [64, 128], strides = [1, 1]} : vector<64x256xf32> to vector<64x128xf32>
    %104 = vector.extract_strided_slice %102 {offsets = [0, 128], sizes = [64, 128], strides = [1, 1]} : vector<64x256xf32> to vector<64x128xf32>
    %105 = math.tanh %104 : vector<64x128xf32>
    %106 = vector.shape_cast %103 : vector<64x128xf32> to vector<4x16x128xf32>
    %107 = arith.truncf %106 : vector<4x16x128xf32> to vector<4x16x128xbf16>
    %c0_30 = arith.constant 0 : index
    %c0_31 = arith.constant 0 : index
    %c0_32 = arith.constant 0 : index
    %108 = vector.load %arg8[%c0_30, %c0_31, %c0_32] : memref<4x16x128xbf16, #tpu.memory_space<vmem>>, vector<4x16x128xbf16>
    tpu.vector_store %arg8[%c0_30, %c0_31, %c0_32], %107 {strides = array<i32>} : memref<4x16x128xbf16, #tpu.memory_space<vmem>>, vector<4x16x128xbf16>,
    %109 = vector.shape_cast %103 : vector<64x128xf32> to vector<4x16x128xf32>
    %110 = vector.shape_cast %105 : vector<64x128xf32> to vector<4x16x128xf32>
    %c0_33 = arith.constant 0 : index
    %c0_34 = arith.constant 0 : index
    %111 = vector.load %arg7[%c0_33, %c0_34] : memref<1x128xf32, #tpu.memory_space<vmem>>, vector<1x128xf32>
    %112 = vector.shape_cast %111 : vector<1x128xf32> to vector<1x1x128xf32>
    %113 = vector.broadcast %112 : vector<1x1x128xf32> to vector<4x16x128xf32>
    %114 = arith.mulf %110, %113 : vector<4x16x128xf32>
    %cst_35 = arith.constant dense<0.000000e+00> : vector<4x16xf32>
    %115 = vector.multi_reduction <add>, %114, %cst_35 [2] : vector<4x16x128xf32> to vector<4x16xf32>
    %116 = vector.shape_cast %115 : vector<4x16xf32> to vector<4x16x1xf32>
    %cst_36 = arith.constant 0.0883883461 : f32
    %117 = vector.broadcast %cst_36 : f32 to vector<4x16x1xf32>
    %118 = arith.mulf %116, %117 : vector<4x16x1xf32>
    %cst_37 = arith.constant dense<0xFF800000> : vector<4x1xf32>
    %119 = vector.multi_reduction <maximumf>, %118, %cst_37 [1] : vector<4x16x1xf32> to vector<4x1xf32>
    %120 = vector.shape_cast %119 : vector<4x1xf32> to vector<4x1x1xf32>
    %121 = vector.broadcast %120 : vector<4x1x1xf32> to vector<4x16x1xf32>
    %122 = arith.subf %118, %121 : vector<4x16x1xf32>
    %123 = math.exp %122 : vector<4x16x1xf32>
    %cst_38 = arith.constant dense<0.000000e+00> : vector<4x1xf32>
    %124 = vector.multi_reduction <add>, %123, %cst_38 [1] : vector<4x16x1xf32> to vector<4x1xf32>
    %125 = vector.shape_cast %124 : vector<4x1xf32> to vector<4x1x1xf32>
    %126 = tpu.reciprocal %125 {approx = true} : vector<4x1x1xf32> -> vector<4x1x1xf32>
    %127 = vector.broadcast %126 : vector<4x1x1xf32> to vector<4x16x1xf32>
    %128 = arith.mulf %123, %127 : vector<4x16x1xf32>
    %129 = vector.broadcast %128 : vector<4x16x1xf32> to vector<4x16x128xf32>
    %130 = arith.mulf %129, %109 : vector<4x16x128xf32>
    %cst_39 = arith.constant dense<0.000000e+00> : vector<4x128xf32>
    %131 = vector.multi_reduction <add>, %130, %cst_39 [1] : vector<4x16x128xf32> to vector<4x128xf32>
    %132 = vector.shape_cast %131 : vector<4x128xf32> to vector<4x1x128xf32>
    %c0_40 = arith.constant 0 : index
    %c0_41 = arith.constant 0 : index
    %c0_42 = arith.constant 0 : index
    %133 = vector.load %arg9[%c0_40, %c0_41, %c0_42] : memref<4x1x128xf32, #tpu.memory_space<vmem>>, vector<4x1x128xf32>
    tpu.vector_store %arg9[%c0_40, %c0_41, %c0_42], %132 {strides = array<i32>} : memref<4x1x128xf32, #tpu.memory_space<vmem>>, vector<4x1x128xf32>,
    return
  }
  func.func @transform_0(%arg0: i32) -> (i32, i32) {
    %c0_i32 = arith.constant 0 : i32
    %c0_i32_0 = arith.constant 0 : i32
    return %arg0, %c0_i32 : i32, i32
  }
  func.func @transform_1(%arg0: i32) -> (i32, i32) {
    %c0_i32 = arith.constant 0 : i32
    %c0_i32_0 = arith.constant 0 : i32
    %c0_i32_1 = arith.constant 0 : i32
    return %c0_i32, %c0_i32_0 : i32, i32
  }
  func.func @transform_2(%arg0: i32) -> (i32, i32) {
    %c0_i32 = arith.constant 0 : i32
    %c0_i32_0 = arith.constant 0 : i32
    %c0_i32_1 = arith.constant 0 : i32
    return %c0_i32, %c0_i32_0 : i32, i32
  }
  func.func @transform_3(%arg0: i32) -> (i32, i32) {
    %c0_i32 = arith.constant 0 : i32
    %c0_i32_0 = arith.constant 0 : i32
    %c0_i32_1 = arith.constant 0 : i32
    return %c0_i32, %c0_i32_0 : i32, i32
  }
  func.func @transform_4(%arg0: i32) -> (i32, i32) {
    %c0_i32 = arith.constant 0 : i32
    %c0_i32_0 = arith.constant 0 : i32
    %c0_i32_1 = arith.constant 0 : i32
    return %c0_i32, %c0_i32_0 : i32, i32
  }
  func.func @transform_5(%arg0: i32) -> (i32, i32) {
    %c0_i32 = arith.constant 0 : i32
    %c0_i32_0 = arith.constant 0 : i32
    %c0_i32_1 = arith.constant 0 : i32
    return %c0_i32, %c0_i32_0 : i32, i32
  }
  func.func @transform_6(%arg0: i32) -> (i32, i32) {
    %c0_i32 = arith.constant 0 : i32
    %c0_i32_0 = arith.constant 0 : i32
    %c0_i32_1 = arith.constant 0 : i32
    return %c0_i32, %c0_i32_0 : i32, i32
  }
  func.func @transform_7(%arg0: i32) -> (i32, i32, i32) {
    %c0_i32 = arith.constant 0 : i32
    %c0_i32_0 = arith.constant 0 : i32
    %c0_i32_1 = arith.constant 0 : i32
    return %arg0, %c0_i32, %c0_i32_0 : i32, i32, i32
  }
  func.func @transform_8(%arg0: i32) -> (i32, i32, i32) {
    %c0_i32 = arith.constant 0 : i32
    %c0_i32_0 = arith.constant 0 : i32
    %c0_i32_1 = arith.constant 0 : i32
    return %arg0, %c0_i32, %c0_i32_0 : i32, i32, i32
  }
}

</mosaic_0001>

<bundles_post_ra>
// kernel: tpu_custom_call.1
= control target key start
LH: loop header
LB: loop body
LE: loop exit
PB: predicated region body
PF: predicated region fallthrough
CT: control target
= control target key end

     0   :  { %14 = vsyncpa [#allocation3], 0  ;;  %s3718_s0 = inlined_call_operand.hbm [shape: s32[4,16], index: 0, kind: input, shape index: {}]   ;;  %s3719_s1 = inlined_call_operand.hbm [shape: bf16[100,128], index: 1, kind: input, shape index: {}]   ;;  %s3720_s2 = inlined_call_operand.hbm [shape: bf16[128,384], index: 2, kind: input, shape index: {}]   ;;  %s3721_s3 = inlined_call_operand.hbm [shape: f32[1,384], index: 3, kind: input, shape index: {}]   ;;  %s3722_s4 = inlined_call_operand.hbm [shape: bf16[128,256], index: 4, kind: input, shape index: {}]   ;;  %s3723_s5 = inlined_call_operand.vmem [shape: f32[1,256], index: 5, kind: input, shape index: {}]   ;;  %s3724_s6 = inlined_call_operand.vmem [shape: f32[1,128], index: 6, kind: input, shape index: {}]   ;;  %s3725_s7 = inlined_call_operand.hbm [shape: bf16[4,16,128], index: 7, kind: output, shape index: {0}]   ;;  %s3726_s8 = inlined_call_operand.hbm [shape: f32[4,1,128], index: 8, kind: output, shape index: {1}]  }
   0x1   :  { %15 = vsyncpa [#allocation6], 0 }
   0x2   :  { %16 = vsyncpa [#allocation9], 0 }
   0x3   :  { %17 = vsyncpa [#allocation4], 0  ;;  %s34_s29 = sshll.u32 %s3719_s1, 4  ;;  %s35_s29 = int_to_ptr.hbm [resolvable:$true] %s34_s29 }
   0x4   :  { %18 = vsyncpa [#allocation13], 0  ;;  %s3052_s30 = smov [#allocation5]   ;;  %s61_s12 = sshll.u32 %s3721_s3, 4  ;;  %s62_s12 = int_to_ptr.hbm [resolvable:$true] %s61_s12 }
   0x5   :  { %s36_s9 = sshll.u32 %s3052_s30, 4  ;;  %s3053_s13 = smov 64   ;;  %s37_s9 = int_to_ptr.vmem [resolvable:$true] %s36_s9 }
   0x6   :  { %s3054_s14 = smov 4   ;;  %s3055_s15 = smov [#allocation8]  }
   0x7   :  { %42 = dma.hbm_to_vmem [thread:$0]  %s35_s29, 832, %s37_s9, [#allocation6], %s3053_s13, %s3053_s13, %s3054_s14  }
   0x8   :  { %s63_s16 = sshll.u32 %s3055_s15, 4  ;;  %s24_s18 = sshll.u32 %s3718_s0, 4  ;;  %s64_s16 = int_to_ptr.vmem [resolvable:$true] %s63_s16  ;;  %s25_s18 = int_to_ptr.hbm [resolvable:$true] %s24_s18 }
   0x9   :  { %66 = dma.hbm_to_vmem [thread:$0]  %s62_s12, 48, %s64_s16, [#allocation9]  }
   0xa   :  { %s47_s3 = sshll.u32 %s3720_s2, 4  ;;  %s3056_s21 = smov [#allocation2]   ;;  %s48_s3 = int_to_ptr.hbm [resolvable:$true] %s47_s3 }
   0xb   :  { %s26_s22 = sshll.u32 %s3056_s21, 4  ;;  %s3057_s23 = smov [#allocation7]   ;;  %s27_s22 = int_to_ptr.vmem [resolvable:$true] %s26_s22 }
   0xc   :  { %29 = dma.hbm_to_vmem [thread:$0]  %s25_s18, 64, %s27_s22, [#allocation3]  }
   0xd   :  { %s49_s24 = sshll.u32 %s3057_s23, 4  ;;  %s3058_s25 = smov 192   ;;  %s50_s24 = int_to_ptr.vmem [resolvable:$true] %s49_s24 }
   0xe   :  { %s3059_s26 = smov 12   ;;  %s71_s28 = sshll.u32 %s3722_s4, 4  ;;  %s72_s28 = int_to_ptr.hbm [resolvable:$true] %s71_s28 }
   0xf   :  { %55 = dma.hbm_to_vmem [thread:$0]  %s48_s3, 3072, %s50_s24, [#allocation6], %s3058_s25, %s3058_s25, %s3059_s26  }
  0x10   :  { %s3060_s29 = smov [#allocation10]   ;;  %s3061_s2 = smov 128  }
  0x11   :  { %s73_s30 = sshll.u32 %s3060_s29, 4  ;;  %s3062_s9 = smov 8   ;;  %s74_s30 = int_to_ptr.vmem [resolvable:$true] %s73_s30 }
  0x12   :  { %79 = dma.hbm_to_vmem [thread:$0]  %s72_s28, 2048, %s74_s30, [#allocation9], %s3061_s2, %s3061_s2, %s3062_s9  }
  0x13   :  { %3042 = dma.done.wait [#allocation3], 64  }
  0x14   :  { %3043 = vsyncadd [#allocation3], 4294967232 }
  0x15   :  { %3044 = dma.done.wait [#allocation6], 3904  }
  0x16   :  { %3045 = vsyncadd [#allocation6], 4294963392 }
  0x17   :  { %3046 = dma.done.wait [#allocation9], 2096  }
  0x18   :  { %3047 = vsyncadd [#allocation9], 4294965200  ;;  %v107_v0 = vlaneseq  ;;  %v105_v2 = vld [vmem:[#allocation2] sm:$0xf]  ;;  %v204_v6 = vld [vmem:[#allocation5 + $0x30] sm:$0x3] }
  0x19   :  { %v132_v3 = vperm.slane %v105_v2, 2  ;;  %v119_v4 = vperm.slane %v105_v2, 1  ;;  %v145_v5 = vperm.slane %v105_v2, 3  ;;  %v250_v7 = vunpack.c.l.b16 %v204_v6  ;;  %v2601_v12 = vld [vmem:[#allocation5 + $0x28] sm:$0xff]  ;;  %v2600_v13 = vld [vmem:[#allocation5 + $0x20] sm:$0xff]  ;;  %v2599_v14 = vld [vmem:[#allocation5 + $0x18] sm:$0xff] }
  0x1a   :  { %v108_v1 = vshrl.u32 %v107_v0, 7  ;;  %vm277_vm0 = vcmask 1041408   ;;  %v106_v11 = vperm.slane %v105_v2, 0  ;;  %v2598_v15 = vld [vmem:[#allocation5 + $0x10] sm:$0xff]  ;;  %v2597_v16 = vld [vmem:[#allocation5 + $0x8] sm:$0xff]  ;;  %v2596_v17 = vld [vmem:[#allocation5] sm:$0xff] }
  0x1b   :  { %v257_v8 = vpack.c.b16 %v250_v7, %v250_v7  ;;  %v3135_v19 = vand.u32 127, %v107_v0  ;;  %v3063_v23 = vmov 0.0   ;;  %vm264_vm3 = vcmask 818176   ;;  %v2490_v34 = vld [vmem:[#allocation7 + $0xa8] sm:$0xf]  ;;  %s3064_s4 = smov 96  }
  0x1c   :  { %2700 = vset.pattern.permute.xlu1 %v108_v1  ;;  %2698 = vset.pattern.permute.xlu0 %v108_v1  ;;  %v115_v9 = vadd.s32 8, %v108_v1  ;;  %v2624_v35 = vld [vmem:[#allocation7 + $0xb0] sm:$0xf0]  ;;  %v2478_v36 = vld [vmem:[#allocation7 + $0x90] sm:$0xf]  ;;  %vm611_vm10 = vcmask 261120  }
  0x1d   :  { %2702 = vset.pattern.permute.xlu2 %v108_v1  ;;  %v279_v10 = vsel %vm277_vm0, %v257_v8, 0  ;;  %v2491_v37 = vor.u32 %v2624_v35, %v2490_v34  ;;  %v2621_v38 = vld [vmem:[#allocation7 + $0x98] sm:$0xf0]  ;;  %v2498_v40 = vld [vmem:[#allocation7 + $0xb0] sm:$0xf]  ;;  %vm722_vm11 = vcmask 130048  }
  0x1e   :  { %2665 = vmatpush.bf16.msra.mxu3 %v279_v10  ;;  %282 = vmatpush.bf16.msra.mxu0 %v279_v10  ;;  %v2625_v41 = vld [vmem:[#allocation7 + $0xb8] sm:$0xf0]  ;;  %v2479_v44 = vor.u32 %v2621_v38, %v2478_v36  ;;  %v2486_v46 = vld [vmem:[#allocation7 + $0x98] sm:$0xf]  ;;  %v2622_v47 = vld [vmem:[#allocation7 + $0xa0] sm:$0xf0] }
  0x1f   :  { %2672 = vmatpush.bf16.msra.mxu2 %v2491_v37  ;;  %482 = vmatpush.bf16.msra.mxu1 %v2491_v37  ;;  %v2499_v45 = vor.u32 %v2625_v41, %v2498_v40  ;;  %v2466_v48 = vld [vmem:[#allocation7 + $0x78] sm:$0xf]  ;;  %v2618_v49 = vld [vmem:[#allocation7 + $0x80] sm:$0xf0]  ;;  %v2487_v50 = vor.u32 %v2622_v47, %v2486_v46  ;;  %v2474_v54 = vld [vmem:[#allocation7 + $0x80] sm:$0xf] }
  0x20   :  { %v2619_v55 = vld [vmem:[#allocation7 + $0x88] sm:$0xf0]  ;;  %v2467_v57 = vor.u32 %v2618_v49, %v2466_v48  ;;  %v2454_v58 = vld [vmem:[#allocation7 + $0x60] sm:$0xf]  ;;  %v2414_v37 = vld [vmem:[#allocation7 + $0x8] sm:$0xf] }
  0x21   :  { %v2615_v59 = vld [vmem:[#allocation7 + $0x68] sm:$0xf0]  ;;  %v2475_v61 = vor.u32 %v2619_v55, %v2474_v54  ;;  %v2426_v34 = vld [vmem:[#allocation7 + $0x20] sm:$0xf]  ;;  %v2604_v38 = vld [vmem:[#allocation7 + $0x10] sm:$0xf0] }
  0x22   :  { %2666 = vmatpush.bf16.msra.mxu3 %v2601_v12  ;;  %283 = vmatpush.bf16.msra.mxu0 %v2601_v12  ;;  %v2455_v2 = vor.u32 %v2615_v59, %v2454_v58  ;;  %v2607_v35 = vld [vmem:[#allocation7 + $0x28] sm:$0xf0]  ;;  %v2492_v41 = vld [vmem:[#allocation7 + $0xb4] sm:$0xf0]  ;;  %v2617_v47 = vld [vmem:[#allocation7 + $0x7c] sm:$0xf] }
  0x23   :  { %2673 = vmatpush.bf16.msra.mxu2 %v2479_v44  ;;  %483 = vmatpush.bf16.msra.mxu1 %v2479_v44  ;;  %v2427_v36 = vor.u32 %v2607_v35, %v2426_v34  ;;  %v2623_v40 = vld [vmem:[#allocation7 + $0xac] sm:$0xf]  ;;  %v2480_v44 = vld [vmem:[#allocation7 + $0x9c] sm:$0xf0]  ;;  %v2468_v48 = vld [vmem:[#allocation7 + $0x84] sm:$0xf0] }
  0x24   :  { %137 = vperm.xlu1 %2700, %v132_v3   ;;  %124 = vperm.xlu0 %2698, %v119_v4   ;;  %v2471_v49 = vor.u32 %v2617_v47, %v2468_v48  ;;  %v2611_v55 = vld [vmem:[#allocation7 + $0x4c] sm:$0xf]  ;;  %v2608_v59 = vld [vmem:[#allocation7 + $0x34] sm:$0xf]  ;;  %s3065_s10 = smov 32   ;;  %vm1955_vm12 = vcmask 523264  }
  0x25   :  { %150 = vperm.xlu2 %2702, %v145_v5   ;;  %vm1964_vm13 = vcmask 785408   ;;  %s2335_s18 = sshll.u32 %s3725_s7, 4  ;;  %s3067_s7 = smov [#allocation12]   ;;  %s2336_s18 = int_to_ptr.hbm [resolvable:$true] %s2335_s18 }
  0x26   :  { %2667 = vmatpush.bf16.msra.mxu3 %v2600_v13  ;;  %284 = vmatpush.bf16.msra.mxu0 %v2600_v13  ;;  %s2348_s20 = sshll.u32 %s3726_s8, 4  ;;  %s3068_s3 = smov 16   ;;  %s2349_s20 = int_to_ptr.hbm [resolvable:$true] %s2348_s20 }
  0x27   :  { %2674 = vmatpush.bf16.msra.mxu2 %v2467_v57  ;;  %484 = vmatpush.bf16.msra.mxu1 %v2467_v57  ;;  %s3069_s21 = smov 1  }
  0x2a   :  { %2668 = vmatpush.bf16.msra.mxu3 %v2599_v14  ;;  %285 = vmatpush.bf16.msra.mxu0 %v2599_v14 }
  0x2b   :  { %2675 = vmatpush.bf16.msra.mxu2 %v2455_v2  ;;  %485 = vmatpush.bf16.msra.mxu1 %v2455_v2 }
  0x2c   :  { %2701 = vset.pattern.permute.xlu1 %v115_v9  ;;  %2699 = vset.pattern.permute.xlu0 %v115_v9 }
  0x2d   :  { %2703 = vset.pattern.permute.xlu2 %v115_v9 }
  0x2e   :  { %2669 = vmatpush.bf16.msra.mxu3 %v2598_v15  ;;  %286 = vmatpush.bf16.msra.mxu0 %v2598_v15 }
  0x32   :  { %2670 = vmatpush.bf16.msra.mxu3 %v2597_v16  ;;  %287 = vmatpush.bf16.msra.mxu0 %v2597_v16  ;;  %v2430_v16 = vld [vmem:[#allocation7 + $0x30] sm:$0xf] }
  0x34   :  { %143 = vperm.xlu1 %2701, %v132_v3   ;;  %130 = vperm.xlu0 %2699, %v119_v4   ;;  %v2442_v4 = vld [vmem:[#allocation7 + $0x48] sm:$0xf] }
  0x35   :  { %156 = vperm.xlu2 %2703, %v145_v5   ;;  %v2612_v5 = vld [vmem:[#allocation7 + $0x50] sm:$0xf0] }
  0x36   :  { %2671 = vmatpush.bf16.msra.mxu3 %v2596_v17  ;;  %288 = vmatpush.bf16.msra.mxu0 %v2596_v17  ;;  %v2443_v8 = vor.u32 %v2612_v5, %v2442_v4  ;;  %v2609_v17 = vld [vmem:[#allocation7 + $0x38] sm:$0xf0]  ;;  %v2602_v4 = vld [vmem:[#allocation7 + $0x4] sm:$0xf]  ;;  %v2408_v5 = vld [vmem:[#allocation7 + $0xc] sm:$0xf0] }
  0x38   :  { %2676 = vmatpush.bf16.msra.mxu2 %v2443_v8  ;;  %486 = vmatpush.bf16.msra.mxu1 %v2443_v8 }
  0x3a   :  { %540 = vmatpush.bf16.msrb.mxu3 %v2499_v45 }
  0x3c   :  { %2704 = vset.pattern.permute.xlu1 %v108_v1 }
  0x3d   :  { %117 = vperm.xlu2 %2703, %v106_v11  }
  0x3e   :  { %541 = vmatpush.bf16.msrb.mxu3 %v2487_v50  ;;  %v2614_v50 = vld [vmem:[#allocation7 + $0x64] sm:$0xf] }
  0x42   :  { %542 = vmatpush.bf16.msrb.mxu3 %v2475_v61 }
  0x44   :  { %111 = vperm.xlu1 %2704, %v106_v11  }
  0x7f   :  { %v3133_v18 = vpop.permute.xlu2 %150 }
  0x80   :  { %vm166_vm8 = vcmp.eq.s32.totalorder %v3133_v18, %v3135_v19  ;;  %v2431_v18 = vor.u32 %v2609_v17, %v2430_v16 }
  0x81   :  { %v2374_v9 = vsel %vm166_vm8, 1.0, %v3063_v23 }
  0x82   :  { %v190_v11 = vpack.c.bf16 %v2374_v9, %v2374_v9  ;;  %2677 = vmatpush.bf16.msra.mxu2 %v2431_v18  ;;  %487 = vmatpush.bf16.msra.mxu1 %v2431_v18 }
  0x84   :  { %v219_v13 = vunpack.c.l.b16 %v190_v11 }
  0x8f   :  { %v3138_v22 = vpop.permute.xlu2 %156 }
  0x90   :  { %vm167_vm9 = vcmp.eq.s32.totalorder %v3138_v22, %v3135_v19  ;;  %v2418_v22 = vld [vmem:[#allocation7 + $0x18] sm:$0xf] }
  0x91   :  { %v2375_v10 = vsel %vm167_vm9, 1.0, %v3063_v23 }
  0x92   :  { %v191_v12 = vpack.c.bf16 %v2375_v10, %v2375_v10 }
  0x94   :  { %v220_v14 = vunpack.c.l.b16 %v191_v12  ;;  %v3161_v12 = vld [vmem:[#allocation8] sm:$0x7] }
  0x96   :  { %v125_v20 = vpop.permute.xlu0 %124  ;;  %v138_v21 = vpop.permute.xlu1 %137  ;;  %v224_v15 = vpack.c.b16 %v220_v14, %v219_v13  ;;  %v348_v13 = vperm.slane %v3161_v12, 0 }
  0x97   :  { %vm162_vm1 = vcmp.eq.s32.totalorder %v125_v20, %v3135_v19  ;;  %v118_v32 = vpop.permute.xlu2 %117  ;;  %vm164_vm4 = vcmp.eq.s32.totalorder %v138_v21, %v3135_v19  ;;  %v2616_v20 = vld [vmem:[#allocation7 + $0x70] sm:$0xf0] }
  0x98   :  { %v2370_v24 = vsel %vm162_vm1, 1.0, %v3063_v23  ;;  %vm161_vm6 = vcmp.eq.s32.totalorder %v118_v32, %v3135_v19  ;;  %v2372_v39 = vsel %vm164_vm4, 1.0, %v3063_v23  ;;  %v2610_v32 = vld [vmem:[#allocation7 + $0x40] sm:$0xf0] }
  0x99   :  { %v186_v26 = vpack.c.bf16 %v2370_v24, %v2370_v24  ;;  %v2369_v43 = vsel %vm161_vm6, 1.0, %v3063_v23  ;;  %v188_v51 = vpack.c.bf16 %v2372_v39, %v2372_v39  ;;  %v2606_v24 = vld [vmem:[#allocation7 + $0x20] sm:$0xf0]  ;;  %v2415_v39 = vor.u32 %v2604_v38, %v2414_v37 }
  0x9a   :  { %v185_v53 = vpack.c.bf16 %v2369_v43, %v2369_v43  ;;  %v2620_v43 = vld [vmem:[#allocation7 + $0x94] sm:$0xf] }
  0x9b   :  { %v215_v29 = vunpack.c.l.b16 %v186_v26  ;;  %v217_v62 = vunpack.c.l.b16 %v188_v51  ;;  %v2613_v26 = vld [vmem:[#allocation7 + $0x58] sm:$0xf0]  ;;  %v2483_v45 = vor.u32 %v2620_v43, %v2480_v44  ;;  %v2456_v51 = vld [vmem:[#allocation7 + $0x6c] sm:$0xf0] }
  0x9c   :  { %v214_v0 = vunpack.c.l.b16 %v185_v53 }
  0xa6   :  { %v131_v25 = vpop.permute.xlu0 %130  ;;  %v144_v31 = vpop.permute.xlu1 %143 }
  0xa7   :  { %vm163_vm2 = vcmp.eq.s32.totalorder %v131_v25, %v3135_v19  ;;  %vm165_vm5 = vcmp.eq.s32.totalorder %v144_v31, %v3135_v19  ;;  %v2450_v25 = vld [vmem:[#allocation7 + $0x50] sm:$0xf]  ;;  %v2438_v31 = vld [vmem:[#allocation7 + $0x38] sm:$0xf] }
  0xa8   :  { %v2371_v27 = vsel %vm163_vm2, 1.0, %v3063_v23  ;;  %v2373_v42 = vsel %vm165_vm5, 1.0, %v3063_v23 }
  0xa9   :  { %v187_v28 = vpack.c.bf16 %v2371_v27, %v2371_v27  ;;  %v189_v52 = vpack.c.bf16 %v2373_v42, %v2373_v42  ;;  %v2451_v27 = vor.u32 %v2613_v26, %v2450_v25  ;;  %v2495_v42 = vor.u32 %v2623_v40, %v2492_v41 }
  0xab   :  { %v216_v30 = vunpack.c.l.b16 %v187_v28  ;;  %v218_v63 = vunpack.c.l.b16 %v189_v52  ;;  %v2406_v28 = vld [vmem:[#allocation7] sm:$0xf]  ;;  %v2459_v52 = vor.u32 %v2614_v50, %v2456_v51 }
  0xad   :  { %v222_v33 = vpack.c.b16 %v216_v30, %v215_v29  ;;  %v223_v7 = vpack.c.b16 %v218_v63, %v217_v62  ;;  %v2603_v29 = vld [vmem:[#allocation7 + $0x8] sm:$0xf0]  ;;  %v2605_v62 = vld [vmem:[#allocation7 + $0x1c] sm:$0xf]  ;;  %v2420_v63 = vld [vmem:[#allocation7 + $0x24] sm:$0xf0] }
  0xae   :  { %v2407_v30 = vor.u32 %v2603_v29, %v2406_v28 }
  0xaf   :  { %2401 = vmatmul.msk.bf16.vlgmr.msra.gmra.mxu3 %vm264_vm3, %v222_v33  ;;  %v2439_v33 = vor.u32 %v2610_v32, %v2438_v31 }
  0xb6   :  { %v112_v56 = vpop.permute.xlu1 %111 }
  0xb7   :  { %vm160_vm7 = vcmp.eq.s32.totalorder %v112_v56, %v3135_v19  ;;  %v2462_v19 = vld [vmem:[#allocation7 + $0x68] sm:$0xf]  ;;  %v2444_v56 = vld [vmem:[#allocation7 + $0x54] sm:$0xf0] }
  0xb8   :  { %v2368_v60 = vsel %vm160_vm7, 1.0, %v3063_v23  ;;  %v2463_v21 = vor.u32 %v2616_v20, %v2462_v19  ;;  %v2419_v23 = vor.u32 %v2606_v24, %v2418_v22  ;;  %v2447_v58 = vor.u32 %v2611_v55, %v2444_v56 }
  0xb9   :  { %v184_v1 = vpack.c.bf16 %v2368_v60, %v2368_v60  ;;  %v2432_v60 = vld [vmem:[#allocation7 + $0x3c] sm:$0xf0]  ;;  %v3165_v22 = vperm.slane %v3161_v12, 2 }
  0xba   :  { %543 = vmatpush.bf16.msrb.mxu3 %v2463_v21  ;;  %2678 = vmatpush.bf16.msra.mxu2 %v2419_v23  ;;  %v2435_v61 = vor.u32 %v2608_v59, %v2432_v60 }
  0xbb   :  { %v213_v3 = vunpack.c.l.b16 %v184_v1  ;;  %488 = vmatpush.bf16.msra.mxu1 %v2419_v23  ;;  %v2423_v1 = vor.u32 %v2605_v62, %v2420_v63 }
  0xbd   :  { %v221_v6 = vpack.c.b16 %v214_v0, %v213_v3 }
  0xbe   :  { %544 = vmatpush.bf16.msrb.mxu3 %v2451_v27  ;;  %2679 = vmatpush.bf16.msra.mxu2 %v2407_v30 }
  0xbf   :  { %2400 = vmatmul.msk.bf16.vlgmr.msra.gmra.mxu0 %vm264_vm3, %v221_v6  ;;  %2402 = vmatmul.msk.bf16.gmra.mxu3 %vm264_vm3, %v223_v7  ;;  %v2411_v6 = vor.u32 %v2602_v4, %v2408_v5 }
  0xc0   :  { %489 = vmatpush.bf16.msra.mxu1 %v2407_v30 }
  0xc2   :  { %545 = vmatpush.bf16.msrb.mxu3 %v2439_v33  ;;  %511 = vmatpush.bf16.msrb.mxu2 %v2495_v42 }
  0xc6   :  { %546 = vmatpush.bf16.msrb.mxu3 %v2427_v36  ;;  %512 = vmatpush.bf16.msrb.mxu2 %v2483_v45 }
  0xca   :  { %547 = vmatpush.bf16.msrb.mxu3 %v2415_v39  ;;  %513 = vmatpush.bf16.msrb.mxu2 %v2471_v49 }
  0xce   :  { %514 = vmatpush.bf16.msrb.mxu2 %v2459_v52 }
  0xcf   :  { %2403 = vmatmul.msk.bf16.gmra.mxu3 %vm264_vm3, %v224_v15 }
  0xd2   :  { %515 = vmatpush.bf16.msrb.mxu2 %v2447_v58 }
  0xd6   :  { %516 = vmatpush.bf16.msrb.mxu2 %v2435_v61 }
  0xda   :  { %517 = vmatpush.bf16.msrb.mxu2 %v2423_v1 }
  0xde   :  { %518 = vmatpush.bf16.msrb.mxu2 %v2411_v6 }
 0x132   :  { %v295_v46 = vpop.f32.mrf.mxu3 }
 0x13a   :  { %v297_v53 = vpop.f32.mrf.mxu3 }
 0x13b   :  { %v311_v54 = vpack.c.bf16 %v297_v53, %v295_v46 }
 0x13c   :  { %v290_v57 = vpop.f32.mrf.mxu0 }
 0x13d   :  { %495 = vmatmul.bf16.vlgmr.msra.gmra.mxu2 %v311_v54 }
 0x142   :  { %v300_v0 = vpop.f32.mrf.mxu3 }
 0x144   :  { %v292_v2 = vpop.f32.mrf.mxu0 }
 0x145   :  { %v310_v3 = vpack.c.bf16 %v292_v2, %v290_v57 }
 0x147   :  { %490 = vmatmul.bf16.vlgmr.msra.gmra.mxu1 %v310_v3  ;;  %548 = vmatmul.bf16.vlgmr.msrb.gmra.mxu3 %v310_v3 }
 0x14a   :  { %v302_v7 = vpop.f32.mrf.mxu3 }
 0x14b   :  { %v312_v8 = vpack.c.bf16 %v302_v7, %v300_v0 }
 0x14d   :  { %500 = vmatmul.bf16.gmra.mxu2 %v312_v8 }
 0x152   :  { %v305_v9 = vpop.f32.mrf.mxu3 }
 0x157   :  { %553 = vmatmul.bf16.gmra.mxu3 %v311_v54 }
 0x15a   :  { %v307_v10 = vpop.f32.mrf.mxu3 }
 0x15b   :  { %v313_v11 = vpack.c.bf16 %v307_v10, %v305_v9  ;;  %v3183_v9 = vperm.slane %v3161_v12, 1 }
 0x15d   :  { %505 = vmatmul.bf16.gmra.mxu2 %v313_v11 }
 0x167   :  { %558 = vmatmul.bf16.gmra.mxu3 %v312_v8 }
 0x16d   :  { %519 = vmatmul.bf16.vlgmr.msrb.gmra.mxu2 %v310_v3 }
 0x177   :  { %563 = vmatmul.bf16.gmra.mxu3 %v313_v11 }
 0x17d   :  { %524 = vmatmul.bf16.gmra.mxu2 %v311_v54 }
 0x18d   :  { %529 = vmatmul.bf16.gmra.mxu2 %v312_v8 }
 0x19d   :  { %534 = vmatmul.bf16.gmra.mxu2 %v313_v11 }
 0x1c0   :  { %v496_v14 = vpop.f32.mrf.mxu2 }
 0x1c1   :  { %v497_v15 = vadd.f32 %v496_v14, %v348_v13 }
 0x1c3   :  { %v571_v18 = vmul.f32 0.17677669, %v497_v15 }
 0x1c4   :  { %v491_v16 = vpop.f32.mrf.mxu1 }
 0x1c5   :  { %v492_v17 = vadd.f32 %v491_v16, %v348_v13  ;;  %v579_v25 = vpack.c.bf16 %v571_v18, %v571_v18 }
 0x1c7   :  { %v569_v19 = vmul.f32 0.17677669, %v492_v17  ;;  %v634_v31 = vunpack.c.l.b16 %v579_v25 }
 0x1c8   :  { %v498_v20 = vpop.f32.mrf.mxu2 }
 0x1c9   :  { %v499_v21 = vadd.f32 %v498_v20, %v348_v13  ;;  %v577_v26 = vpack.c.bf16 %v569_v19, %v569_v19 }
 0x1ca   :  { %v549_v24 = vpop.f32.mrf.mxu3 }
 0x1cb   :  { %v572_v23 = vmul.f32 0.17677669, %v499_v21  ;;  %v550_v29 = vadd.f32 %v549_v24, %v3165_v22  ;;  %v603_v34 = vunpack.c.l.b16 %v577_v26 }
 0x1cc   :  { %v493_v27 = vpop.f32.mrf.mxu1 }
 0x1cd   :  { %v580_v28 = vpack.c.bf16 %v572_v23, %v572_v23  ;;  %v494_v30 = vadd.f32 %v493_v27, %v348_v13  ;;  %v593_v37 = vpack.c.bf16 %v550_v29, %v550_v29 }
 0x1cf   :  { %v635_v32 = vunpack.c.l.b16 %v580_v28  ;;  %v570_v33 = vmul.f32 0.17677669, %v494_v30  ;;  %v826_v43 = vunpack.c.l.b16 %v593_v37 }
 0x1d0   :  { %v501_v35 = vpop.f32.mrf.mxu2 }
 0x1d1   :  { %v3168_v36 = vpack.c.b16 %v635_v32, %v634_v31  ;;  %v578_v38 = vpack.c.bf16 %v570_v33, %v570_v33  ;;  %v502_v39 = vadd.f32 %v501_v35, %v348_v13 }
 0x1d2   :  { %v551_v40 = vpop.f32.mrf.mxu3 }
 0x1d3   :  { %v604_v41 = vunpack.c.l.b16 %v578_v38  ;;  %v552_v42 = vadd.f32 %v551_v40, %v3165_v22  ;;  %v573_v46 = vmul.f32 0.17677669, %v502_v39 }
 0x1d5   :  { %v3171_v44 = vpack.c.b16 %v604_v41, %v603_v34  ;;  %v594_v45 = vpack.c.bf16 %v552_v42, %v552_v42  ;;  %v581_v52 = vpack.c.bf16 %v573_v46, %v573_v46 }
 0x1d7   :  { %v827_v47 = vunpack.c.l.b16 %v594_v45  ;;  %939 = vrot.lane.b32.xlu1 %v3171_v44, %s3064_s4  ;;  %v664_v55 = vunpack.c.l.b16 %v581_v52 }
 0x1d8   :  { %v503_v48 = vpop.f32.mrf.mxu2 }
 0x1d9   :  { %v3175_v49 = vpack.c.b16 %v827_v47, %v826_v43  ;;  %v504_v50 = vadd.f32 %v503_v48, %v348_v13 }
 0x1da   :  { %v554_v51 = vpop.f32.mrf.mxu3 }
 0x1db   :  { %v574_v53 = vmul.f32 0.17677669, %v504_v50  ;;  %v555_v30 = vadd.f32 %v554_v51, %v3165_v22 }
 0x1dd   :  { %v582_v54 = vpack.c.bf16 %v574_v53, %v574_v53  ;;  %v595_v35 = vpack.c.bf16 %v555_v30, %v555_v30 }
 0x1df   :  { %v665_v56 = vunpack.c.l.b16 %v582_v54  ;;  %v854_v41 = vunpack.c.l.b16 %v595_v35 }
 0x1e0   :  { %v506_v57 = vpop.f32.mrf.mxu2 }
 0x1e1   :  { %v3177_v58 = vpack.c.b16 %v665_v56, %v664_v55  ;;  %v507_v59 = vadd.f32 %v506_v57, %v348_v13 }
 0x1e2   :  { %v556_v60 = vpop.f32.mrf.mxu3 }
 0x1e3   :  { %v575_v61 = vmul.f32 0.17677669, %v507_v59  ;;  %v557_v28 = vadd.f32 %v556_v60, %v3165_v22 }
 0x1e5   :  { %v583_v1 = vpack.c.bf16 %v575_v61, %v575_v61  ;;  %v596_v32 = vpack.c.bf16 %v557_v28, %v557_v28 }
 0x1e7   :  { %v694_v4 = vunpack.c.l.b16 %v583_v1  ;;  %v855_v38 = vunpack.c.l.b16 %v596_v32 }
 0x1e8   :  { %v508_v62 = vpop.f32.mrf.mxu2 }
 0x1e9   :  { %v509_v63 = vadd.f32 %v508_v62, %v348_v13  ;;  %v3205_v45 = vpack.c.b16 %v855_v38, %v854_v41 }
 0x1ea   :  { %v559_v0 = vpop.f32.mrf.mxu3 }
 0x1eb   :  { %v576_v2 = vmul.f32 0.17677669, %v509_v63  ;;  %v560_v6 = vadd.f32 %v559_v0, %v3165_v22 }
 0x1ed   :  { %v584_v3 = vpack.c.bf16 %v576_v2, %v576_v2  ;;  %v597_v11 = vpack.c.bf16 %v560_v6, %v560_v6 }
 0x1ef   :  { %v695_v5 = vunpack.c.l.b16 %v584_v3  ;;  %v882_v16 = vunpack.c.l.b16 %v597_v11 }
 0x1f0   :  { %v520_v7 = vpop.f32.mrf.mxu2 }
 0x1f1   :  { %v3180_v8 = vpack.c.b16 %v695_v5, %v694_v4  ;;  %v521_v13 = vadd.f32 %v520_v7, %v3183_v9 }
 0x1f2   :  { %v561_v10 = vpop.f32.mrf.mxu3 }
 0x1f3   :  { %v562_v14 = vadd.f32 %v561_v10, %v3165_v22  ;;  %v585_v19 = vpack.c.bf16 %v521_v13, %v521_v13 }
 0x1f5   :  { %v598_v15 = vpack.c.bf16 %v562_v14, %v562_v14  ;;  %v608_v12 = vunpack.c.l.b16 %v585_v19 }
 0x1f7   :  { %v883_v17 = vunpack.c.l.b16 %v598_v15 }
 0x1f8   :  { %v522_v18 = vpop.f32.mrf.mxu2 }
 0x1f9   :  { %v3187_v20 = vpack.c.b16 %v883_v17, %v882_v16  ;;  %v523_v21 = vadd.f32 %v522_v18, %v3183_v9 }
 0x1fa   :  { %v564_v48 = vpop.f32.mrf.mxu3 }
 0x1fb   :  { %v586_v24 = vpack.c.bf16 %v523_v21, %v523_v21  ;;  %896 = vmatpush.bf16.msra.mxu2 %v3187_v20  ;;  %v565_v63 = vadd.f32 %v564_v48, %v3165_v22 }
 0x1fd   :  { %v609_v25 = vunpack.c.l.b16 %v586_v24  ;;  %v599_v4 = vpack.c.bf16 %v565_v63, %v565_v63 }
 0x1ff   :  { %v3191_v23 = vpack.c.b16 %v609_v25, %v608_v12  ;;  %v910_v11 = vunpack.c.l.b16 %v599_v4 }
 0x200   :  { %v525_v26 = vpop.f32.mrf.mxu2 }
 0x201   :  { %941 = vrot.lane.b32.xlu0 %v3191_v23, %s3064_s4  ;;  %v616_v27 = vsel %vm611_vm10, %v3191_v23, 0  ;;  %v526_v29 = vadd.f32 %v525_v26, %v3183_v9 }
 0x202   :  { %625 = vmatpush.bf16.xpose.msrb.mxu0 %v616_v27  ;;  %v566_v60 = vpop.f32.mrf.mxu3 }
 0x203   :  { %v587_v33 = vpack.c.bf16 %v526_v29, %v526_v29  ;;  %v567_v61 = vadd.f32 %v566_v60, %v3165_v22 }
 0x205   :  { %v639_v39 = vunpack.c.l.b16 %v587_v33  ;;  %v600_v1 = vpack.c.bf16 %v567_v61, %v567_v61 }
 0x207   :  { %v911_v6 = vunpack.c.l.b16 %v600_v1 }
 0x208   :  { %v527_v31 = vpop.f32.mrf.mxu2 }
 0x209   :  { %v528_v34 = vadd.f32 %v527_v31, %v3183_v9  ;;  %2500 = vmatmul.msk.bf16.vlgmr.msrb.gmra.mxu0 %vm611_vm10, %v3171_v44  ;;  %v3227_v13 = vpack.c.b16 %v911_v6, %v910_v11 }
 0x20b   :  { %v588_v37 = vpack.c.bf16 %v528_v34, %v528_v34 }
 0x20d   :  { %v640_v40 = vunpack.c.l.b16 %v588_v37 }
 0x20f   :  { %v3203_v42 = vpack.c.b16 %v640_v40, %v639_v39 }
 0x210   :  { %v530_v43 = vpop.f32.mrf.mxu2 }
 0x211   :  { %v646_v46 = vsel %vm611_vm10, %v3203_v42, 0  ;;  %v531_v47 = vadd.f32 %v530_v43, %v3183_v9 }
 0x212   :  { %655 = vmatpush.bf16.xpose.msrb.mxu1 %v646_v46 }
 0x213   :  { %v589_v51 = vpack.c.bf16 %v531_v47, %v531_v47 }
 0x215   :  { %v669_v54 = vunpack.c.l.b16 %v589_v51 }
 0x218   :  { %v532_v50 = vpop.f32.mrf.mxu2 }
 0x219   :  { %v533_v52 = vadd.f32 %v532_v50, %v3183_v9  ;;  %2501 = vmatmul.msk.bf16.vlgmr.msrb.gmra.mxu1 %vm611_vm10, %v3168_v36 }
 0x21a   :  { %868 = vmatpush.bf16.msra.mxu1 %v3205_v45 }
 0x21b   :  { %v590_v53 = vpack.c.bf16 %v533_v52, %v533_v52 }
 0x21d   :  { %v670_v55 = vunpack.c.l.b16 %v590_v53 }
 0x21f   :  { %v3214_v56 = vpack.c.b16 %v670_v55, %v669_v54 }
 0x220   :  { %v535_v57 = vpop.f32.mrf.mxu2 }
 0x221   :  { %v676_v59 = vsel %vm611_vm10, %v3214_v56, 0  ;;  %v536_v62 = vadd.f32 %v535_v57, %v3183_v9 }
 0x222   :  { %685 = vmatpush.bf16.xpose.msra.mxu0 %v676_v59 }
 0x223   :  { %v591_v2 = vpack.c.bf16 %v536_v62, %v536_v62 }
 0x225   :  { %v699_v7 = vunpack.c.l.b16 %v591_v2 }
 0x228   :  { %v537_v0 = vpop.f32.mrf.mxu2 }
 0x229   :  { %v538_v3 = vadd.f32 %v537_v0, %v3183_v9  ;;  %2502 = vmatmul.msk.bf16.vlgmr.msra.gmra.mxu0 %vm611_vm10, %v3177_v58 }
 0x22a   :  { %840 = vmatpush.bf16.msrb.mxu0 %v3175_v49 }
 0x22b   :  { %v592_v5 = vpack.c.bf16 %v538_v3, %v538_v3 }
 0x22d   :  { %v700_v10 = vunpack.c.l.b16 %v592_v5 }
 0x22f   :  { %v3225_v14 = vpack.c.b16 %v700_v10, %v699_v7 }
 0x231   :  { %v706_v22 = vsel %vm611_vm10, %v3225_v14, 0 }
 0x232   :  { %715 = vmatpush.bf16.xpose.msra.mxu3 %v706_v22 }
 0x239   :  { %2503 = vmatmul.msk.bf16.vlgmr.msra.gmra.mxu3 %vm611_vm10, %v3180_v8 }
 0x23a   :  { %924 = vmatpush.bf16.msrb.mxu3 %v3227_v13 }
 0x249   :  { %v3249_v34 = vpop.permute.xlu1 %939 }
 0x273   :  { %v942_v9 = vpop.permute.xlu0 %941 }
 0x274   :  { %v947_v15 = vsel %vm611_vm10, %v942_v9, 0 }
 0x275   :  { %956 = vmatpush.bf16.xpose.msra.mxu0 %v947_v15 }
 0x286   :  { %v627_v16 = vpop.f32.mrf.mxu0 }
 0x287   :  { %v723_v17 = vsel %vm722_vm11, %v627_v16, -inf }
 0x288   :  { %724 = vmax.xlane.f32.xlu0 %v723_v17 }
 0x28e   :  { %v629_v18 = vpop.f32.mrf.mxu0 }
 0x28f   :  { %v726_v19 = vsel %vm722_vm11, %v629_v18, -inf }
 0x290   :  { %727 = vmax.xlane.f32.xlu1 %v726_v19 }
 0x296   :  { %v657_v21 = vpop.f32.mrf.mxu1 }
 0x297   :  { %v729_v24 = vsel %vm722_vm11, %v657_v21, -inf }
 0x298   :  { %730 = vmax.xlane.f32.xlu0 %v729_v24 }
 0x29e   :  { %v659_v12 = vpop.f32.mrf.mxu1 }
 0x29f   :  { %v732_v25 = vsel %vm722_vm11, %v659_v12, -inf }
 0x2a0   :  { %733 = vmax.xlane.f32.xlu1 %v732_v25 }
 0x2a6   :  { %v687_v26 = vpop.f32.mrf.mxu0 }
 0x2a7   :  { %v735_v27 = vsel %vm722_vm11, %v687_v26, -inf }
 0x2a8   :  { %736 = vmax.xlane.f32.xlu2 %v735_v27 }
 0x2ae   :  { %v689_v28 = vpop.f32.mrf.mxu0 }
 0x2af   :  { %v738_v29 = vsel %vm722_vm11, %v689_v28, -inf }
 0x2b0   :  { %739 = vmax.xlane.f32.xlu2 %v738_v29 }
 0x2b9   :  { %987 = vrot.lane.b32.xlu1 %v3177_v58, %s3064_s4 }
 0x2bc   :  { %v717_v30 = vpop.f32.mrf.mxu3 }
 0x2bd   :  { %v741_v31 = vsel %vm722_vm11, %v717_v30, -inf }
 0x2be   :  { %742 = vmax.xlane.f32.xlu2 %v741_v31 }
 0x2c4   :  { %v719_v32 = vpop.f32.mrf.mxu3 }
 0x2c5   :  { %v744_v33 = vsel %vm722_vm11, %v719_v32, -inf }
 0x2c6   :  { %745 = vmax.xlane.f32.xlu0 %v744_v33 }
 0x2d6   :  { %989 = vrot.lane.b32.xlu2 %v3214_v56, %s3064_s4 }
 0x2da   :  { %965 = vrot.lane.b32.xlu0 %v3203_v42, %s3064_s4 }
 0x2fb   :  { %v725_v35 = vpop.xlane.xlu0 %724 }
 0x2fc   :  { %v747_v37 = vsub.f32 %v627_v16, %v725_v35 }
 0x2fe   :  { %v755_v38 = vmul.f32 1.442695, %v747_v37 }
 0x300   :  { %2706 = vpow2.f32 %v755_v38 }
 0x303   :  { %v728_v39 = vpop.xlane.xlu1 %727 }
 0x304   :  { %v748_v40 = vsub.f32 %v629_v18, %v728_v39 }
 0x306   :  { %v3251_v41 = vpop.eup %2706  ;;  %v757_v43 = vmul.f32 1.442695, %v748_v40 }
 0x307   :  { %v771_v46 = vsel %vm722_vm11, %v3251_v41, 0.0 }
 0x308   :  { %2708 = vpow2.f32 %v757_v43  ;;  %772 = vadd.xlane.f32.xlu1 %v771_v46 }
 0x30b   :  { %v731_v47 = vpop.xlane.xlu0 %730 }
 0x30c   :  { %v749_v48 = vsub.f32 %v657_v21, %v731_v47 }
 0x30e   :  { %v3255_v50 = vpop.eup %2708  ;;  %v759_v51 = vmul.f32 1.442695, %v749_v48 }
 0x30f   :  { %v774_v52 = vsel %vm722_vm11, %v3255_v50, 0.0 }
 0x310   :  { %2710 = vpow2.f32 %v759_v51  ;;  %775 = vadd.xlane.f32.xlu2 %v774_v52 }
 0x313   :  { %v734_v53 = vpop.xlane.xlu1 %733 }
 0x314   :  { %v750_v54 = vsub.f32 %v659_v12, %v734_v53 }
 0x316   :  { %v3259_v55 = vpop.eup %2710  ;;  %v761_v57 = vmul.f32 1.442695, %v750_v54 }
 0x317   :  { %v777_v59 = vsel %vm722_vm11, %v3259_v55, 0.0 }
 0x318   :  { %2712 = vpow2.f32 %v761_v57  ;;  %778 = vadd.xlane.f32.xlu2 %v777_v59 }
 0x31b   :  { %v737_v60 = vpop.xlane.xlu2 %736 }
 0x31c   :  { %v751_v61 = vsub.f32 %v687_v26, %v737_v60 }
 0x31e   :  { %v3263_v62 = vpop.eup %2712  ;;  %v763_v63 = vmul.f32 1.442695, %v751_v61 }
 0x31f   :  { %v780_v0 = vsel %vm722_vm11, %v3263_v62, 0.0 }
 0x320   :  { %2714 = vpow2.f32 %v763_v63  ;;  %781 = vadd.xlane.f32.xlu0 %v780_v0 }
 0x323   :  { %v740_v1 = vpop.xlane.xlu2 %739 }
 0x324   :  { %v752_v2 = vsub.f32 %v689_v28, %v740_v1 }
 0x326   :  { %v3267_v3 = vpop.eup %2714  ;;  %v765_v4 = vmul.f32 1.442695, %v752_v2 }
 0x327   :  { %v783_v5 = vsel %vm722_vm11, %v3267_v3, 0.0 }
 0x328   :  { %2716 = vpow2.f32 %v765_v4  ;;  %784 = vadd.xlane.f32.xlu0 %v783_v5 }
 0x32b   :  { %v988_v27 = vpop.permute.xlu1 %987 }
 0x32e   :  { %v3271_v6 = vpop.eup %2716 }
 0x32f   :  { %v786_v7 = vsel %vm722_vm11, %v3271_v6, 0.0 }
 0x330   :  { %787 = vadd.xlane.f32.xlu1 %v786_v7 }
 0x331   :  { %v743_v10 = vpop.xlane.xlu2 %742 }
 0x332   :  { %v753_v11 = vsub.f32 %v717_v30, %v743_v10 }
 0x334   :  { %v767_v22 = vmul.f32 1.442695, %v753_v11 }
 0x336   :  { %2718 = vpow2.f32 %v767_v22 }
 0x339   :  { %v746_v9 = vpop.xlane.xlu0 %745  ;;  %v990_v15 = vpop.permute.xlu2 %989 }
 0x33a   :  { %v754_v16 = vsub.f32 %v719_v32, %v746_v9  ;;  %v995_v17 = vsel %vm611_vm10, %v990_v15, 0 }
 0x33b   :  { %1004 = vmatpush.bf16.xpose.msrb.mxu2 %v995_v17 }
 0x33c   :  { %v3276_v18 = vpop.eup %2718  ;;  %v769_v19 = vmul.f32 1.442695, %v754_v16  ;;  %963 = vrot.lane.b32.xlu0 %v3168_v36, %s3064_s4 }
 0x33d   :  { %v789_v21 = vsel %vm722_vm11, %v3276_v18, 0.0 }
 0x33e   :  { %2720 = vpow2.f32 %v769_v19  ;;  %790 = vadd.xlane.f32.xlu1 %v789_v21 }
 0x344   :  { %v3282_v24 = vpop.eup %2720 }
 0x345   :  { %v792_v12 = vsel %vm722_vm11, %v3282_v24, 0.0 }
 0x346   :  { %793 = vadd.xlane.f32.xlu2 %v792_v12 }
 0x34c   :  { %v966_v25 = vpop.permute.xlu0 %965 }
 0x34d   :  { %v971_v26 = vsel %vm611_vm10, %v966_v25, 0 }
 0x34e   :  { %980 = vmatpush.bf16.xpose.msrb.mxu1 %v971_v26 }
 0x357   :  { %1011 = vrot.lane.b32.xlu1 %v3180_v8, %s3064_s4 }
 0x35e   :  { %1013 = vrot.lane.b32.xlu2 %v3225_v14, %s3064_s4 }
 0x35f   :  { %1241 = vrot.lane.b32.xlu1 %v3191_v23, %s3053_s13 }
 0x366   :  { %1136 = vrot.lane.b32.xlu2 %v3175_v49, %s3064_s4 }
 0x37b   :  { %v773_v28 = vpop.xlane.xlu1 %772 }
 0x37c   :  { %2722 = vrcp.f32 %v773_v28 }
 0x382   :  { %v2723_v30 = vpop.eup %2722 }
 0x383   :  { %v776_v29 = vpop.xlane.xlu2 %775  ;;  %v803_v31 = vmul.f32 %v2723_v30, %v3251_v41 }
 0x384   :  { %2724 = vrcp.f32 %v776_v29 }
 0x385   :  { %v811_v33 = vpack.c.bf16 %v803_v31, %v803_v31 }
 0x387   :  { %v821_v39 = vunpack.c.l.b16 %v811_v33 }
 0x38a   :  { %v2725_v32 = vpop.eup %2724 }
 0x38b   :  { %v804_v35 = vmul.f32 %v2725_v32, %v3255_v50  ;;  %v779_v37 = vpop.xlane.xlu2 %778 }
 0x38c   :  { %2726 = vrcp.f32 %v779_v37 }
 0x38d   :  { %v812_v38 = vpack.c.bf16 %v804_v35, %v804_v35 }
 0x38f   :  { %v822_v40 = vunpack.c.l.b16 %v812_v38 }
 0x391   :  { %v823_v43 = vpack.c.b16 %v822_v40, %v821_v39 }
 0x392   :  { %v2727_v47 = vpop.eup %2726 }
 0x393   :  { %v782_v46 = vpop.xlane.xlu0 %781  ;;  %2504 = vmatmul.msk.bf16.vlgmr.msrb.gmra.mxu0 %vm722_vm11, %v823_v43  ;;  %v805_v48 = vmul.f32 %v2727_v47, %v3259_v55 }
 0x394   :  { %2728 = vrcp.f32 %v782_v46 }
 0x395   :  { %v813_v52 = vpack.c.bf16 %v805_v48, %v805_v48 }
 0x397   :  { %v849_v50 = vunpack.c.l.b16 %v813_v52 }
 0x39a   :  { %v2729_v51 = vpop.eup %2728 }
 0x39b   :  { %v806_v41 = vmul.f32 %v2729_v51, %v3263_v62  ;;  %v785_v53 = vpop.xlane.xlu0 %784 }
 0x39c   :  { %2730 = vrcp.f32 %v785_v53 }
 0x39d   :  { %v814_v54 = vpack.c.bf16 %v806_v41, %v806_v41 }
 0x39f   :  { %v850_v57 = vunpack.c.l.b16 %v814_v54 }
 0x3a1   :  { %v851_v59 = vpack.c.b16 %v850_v57, %v849_v50 }
 0x3a2   :  { %v2731_v61 = vpop.eup %2730 }
 0x3a3   :  { %v788_v60 = vpop.xlane.xlu1 %787  ;;  %2505 = vmatmul.msk.bf16.vlgmr.msra.gmra.mxu1 %vm722_vm11, %v851_v59  ;;  %2508 = vmatmul.msk.bf16.vlgmr.msra.gmra.mxu0 %vm611_vm10, %v3249_v34  ;;  %v807_v55 = vmul.f32 %v2731_v61, %v3267_v3 }
 0x3a4   :  { %2732 = vrcp.f32 %v788_v60 }
 0x3a5   :  { %v815_v0 = vpack.c.bf16 %v807_v55, %v807_v55 }
 0x3a7   :  { %v877_v2 = vunpack.c.l.b16 %v815_v0 }
 0x3aa   :  { %v2733_v63 = vpop.eup %2732 }
 0x3ab   :  { %v808_v62 = vmul.f32 %v2733_v63, %v3271_v6 }
 0x3ad   :  { %v816_v1 = vpack.c.bf16 %v808_v62, %v808_v62 }
 0x3ae   :  { %v964_v10 = vpop.permute.xlu0 %963 }
 0x3af   :  { %v878_v4 = vunpack.c.l.b16 %v816_v1 }
 0x3b1   :  { %v879_v5 = vpack.c.b16 %v878_v4, %v877_v2  ;;  %v791_v7 = vpop.xlane.xlu1 %790 }
 0x3b2   :  { %2734 = vrcp.f32 %v791_v7 }
 0x3b3   :  { %2506 = vmatmul.msk.bf16.vlgmr.msra.gmra.mxu2 %vm722_vm11, %v879_v5  ;;  %2509 = vmatmul.msk.bf16.vlgmr.msrb.gmra.mxu1 %vm611_vm10, %v964_v10 }
 0x3b8   :  { %v2735_v11 = vpop.eup %2734 }
 0x3b9   :  { %v794_v34 = vpop.xlane.xlu2 %793  ;;  %v809_v3 = vmul.f32 %v2735_v11, %v3276_v18 }
 0x3ba   :  { %2736 = vrcp.f32 %v794_v34 }
 0x3bb   :  { %v817_v9 = vpack.c.bf16 %v809_v3, %v809_v3 }
 0x3bd   :  { %v905_v19 = vunpack.c.l.b16 %v817_v9 }
 0x3c0   :  { %v2737_v22 = vpop.eup %2736 }
 0x3c1   :  { %v810_v6 = vmul.f32 %v2737_v22, %v3282_v24  ;;  %v1014_v15 = vpop.permute.xlu2 %1013 }
 0x3c2   :  { %v1019_v16 = vsel %vm611_vm10, %v1014_v15, 0 }
 0x3c3   :  { %v818_v17 = vpack.c.bf16 %v810_v6, %v810_v6  ;;  %2510 = vmatmul.msk.bf16.vlgmr.msrb.gmra.mxu2 %vm611_vm10, %v988_v27  ;;  %1028 = vmatpush.bf16.xpose.msra.mxu3 %v1019_v16 }
 0x3c5   :  { %v906_v21 = vunpack.c.l.b16 %v818_v17 }
 0x3c7   :  { %v907_v12 = vpack.c.b16 %v906_v21, %v905_v19 }
 0x3c9   :  { %v1012_v25 = vpop.permute.xlu1 %1011  ;;  %2507 = vmatmul.msk.bf16.vlgmr.msrb.gmra.mxu3 %vm722_vm11, %v907_v12  ;;  %v1137_v26 = vpop.permute.xlu2 %1136 }
 0x3ca   :  { %1149 = vmatpush.bf16.msrb.mxu0 %v1137_v26 }
 0x3d1   :  { %v1242_v18 = vpop.permute.xlu1 %1241 }
 0x3d2   :  { %v1247_v28 = vsel %vm611_vm10, %v1242_v18, 0 }
 0x3d3   :  { %1256 = vmatpush.bf16.xpose.msra.mxu0 %v1247_v28 }
 0x3d9   :  { %2511 = vmatmul.msk.bf16.vlgmr.msra.gmra.mxu3 %vm611_vm10, %v1012_v25 }
 0x410   :  { %v842_v24 = vpop.f32.mrf.mxu0 }
 0x411   :  { %v931_v29 = vpack.c.bf16 %v842_v24, %v842_v24 }
 0x413   :  { %v3314_v27 = vunpack.c.l.b16 %v931_v29 }
 0x418   :  { %v844_v30 = vpop.f32.mrf.mxu0 }
 0x419   :  { %v932_v31 = vpack.c.bf16 %v844_v30, %v844_v30 }
 0x41b   :  { %v3316_v32 = vunpack.c.l.b16 %v932_v31 }
 0x41d   :  { %v1855_v33 = vpack.c.b16 %v3316_v32, %v3314_v27 }
 0x420   :  { %v870_v35 = vpop.f32.mrf.mxu1  ;;  %v958_v37 = vpop.f32.mrf.mxu0 }
 0x421   :  { %v1035_v38 = vsel %vm722_vm11, %v958_v37, -inf  ;;  %v933_v39 = vpack.c.bf16 %v870_v35, %v870_v35 }
 0x422   :  { %1036 = vmax.xlane.f32.xlu0 %v1035_v38 }
 0x423   :  { %v3322_v48 = vunpack.c.l.b16 %v933_v39 }
 0x428   :  { %v872_v40 = vpop.f32.mrf.mxu1  ;;  %v960_v43 = vpop.f32.mrf.mxu0 }
 0x429   :  { %v934_v46 = vpack.c.bf16 %v872_v40, %v872_v40  ;;  %v1038_v47 = vsel %vm722_vm11, %v960_v43, -inf }
 0x42a   :  { %1039 = vmax.xlane.f32.xlu2 %v1038_v47 }
 0x42b   :  { %v3324_v51 = vunpack.c.l.b16 %v934_v46 }
 0x42d   :  { %v1856_v52 = vpack.c.b16 %v3324_v51, %v3322_v48 }
 0x430   :  { %v982_v41 = vpop.f32.mrf.mxu1 }
 0x431   :  { %v1041_v53 = vsel %vm722_vm11, %v982_v41, -inf }
 0x432   :  { %1042 = vmax.xlane.f32.xlu2 %v1041_v53 }
 0x436   :  { %v898_v54 = vpop.f32.mrf.mxu2 }
 0x437   :  { %v935_v59 = vpack.c.bf16 %v898_v54, %v898_v54 }
 0x438   :  { %v984_v50 = vpop.f32.mrf.mxu1 }
 0x439   :  { %v1044_v57 = vsel %vm722_vm11, %v984_v50, -inf  ;;  %v3330_v55 = vunpack.c.l.b16 %v935_v59 }
 0x43a   :  { %1045 = vmax.xlane.f32.xlu1 %v1044_v57 }
 0x43e   :  { %v900_v60 = vpop.f32.mrf.mxu2 }
 0x43f   :  { %v936_v61 = vpack.c.bf16 %v900_v60, %v900_v60 }
 0x441   :  { %v3332_v63 = vunpack.c.l.b16 %v936_v61 }
 0x443   :  { %v1857_v0 = vpack.c.b16 %v3332_v63, %v3330_v55 }
 0x446   :  { %v1006_v62 = vpop.f32.mrf.mxu2 }
 0x447   :  { %v1047_v1 = vsel %vm722_vm11, %v1006_v62, -inf }
 0x448   :  { %1048 = vmax.xlane.f32.xlu1 %v1047_v1 }
 0x44c   :  { %v926_v2 = vpop.f32.mrf.mxu3 }
 0x44d   :  { %v937_v7 = vpack.c.bf16 %v926_v2, %v926_v2 }
 0x44e   :  { %v1008_v4 = vpop.f32.mrf.mxu2 }
 0x44f   :  { %v1050_v5 = vsel %vm722_vm11, %v1008_v4, -inf  ;;  %v3338_v11 = vunpack.c.l.b16 %v937_v7 }
 0x450   :  { %1051 = vmax.xlane.f32.xlu0 %v1050_v5 }
 0x454   :  { %v928_v10 = vpop.f32.mrf.mxu3 }
 0x455   :  { %v938_v34 = vpack.c.bf16 %v928_v10, %v928_v10 }
 0x457   :  { %v3340_v3 = vunpack.c.l.b16 %v938_v34 }
 0x459   :  { %v1858_v22 = vpack.c.b16 %v3340_v3, %v3338_v11 }
 0x45c   :  { %v1030_v9 = vpop.f32.mrf.mxu3 }
 0x45d   :  { %v1053_v6 = vsel %vm722_vm11, %v1030_v9, -inf }
 0x45e   :  { %1054 = vmax.xlane.f32.xlu0 %v1053_v6 }
 0x461   :  { %1239 = vrot.lane.b32.xlu1 %v3171_v44, %s3053_s13 }
 0x464   :  { %v1032_v15 = vpop.f32.mrf.mxu3 }
 0x465   :  { %v1056_v16 = vsel %vm722_vm11, %v1032_v15, -inf }
 0x466   :  { %1057 = vmax.xlane.f32.xlu2 %v1056_v16 }
 0x469   :  { %1289 = vrot.lane.b32.xlu1 %v3214_v56, %s3053_s13 }
 0x471   :  { %1265 = vrot.lane.b32.xlu1 %v3203_v42, %s3053_s13 }
 0x472   :  { %1186 = vrot.lane.b32.xlu0 %v3187_v20, %s3064_s4 }
 0x479   :  { %1211 = vrot.lane.b32.xlu1 %v3227_v13, %s3064_s4 }
 0x47e   :  { %1161 = vrot.lane.b32.xlu2 %v3205_v45, %s3064_s4 }
 0x495   :  { %v1037_v17 = vpop.xlane.xlu0 %1036 }
 0x496   :  { %v1059_v19 = vsub.f32 %v958_v37, %v1037_v17 }
 0x498   :  { %v1067_v21 = vmul.f32 1.442695, %v1059_v19 }
 0x49a   :  { %2738 = vpow2.f32 %v1067_v21 }
 0x49d   :  { %v1040_v12 = vpop.xlane.xlu2 %1039 }
 0x49e   :  { %v1060_v25 = vsub.f32 %v960_v43, %v1040_v12 }
 0x4a0   :  { %v3358_v26 = vpop.eup %2738  ;;  %v1069_v18 = vmul.f32 1.442695, %v1060_v25 }
 0x4a1   :  { %v1083_v28 = vsel %vm722_vm11, %v3358_v26, 0.0 }
 0x4a2   :  { %2740 = vpow2.f32 %v1069_v18 }
 0x4a3   :  { %1084 = vadd.xlane.f32.xlu1 %v1083_v28 }
 0x4a5   :  { %v1043_v24 = vpop.xlane.xlu2 %1042 }
 0x4a6   :  { %v1061_v29 = vsub.f32 %v982_v41, %v1043_v24 }
 0x4a8   :  { %v3362_v30 = vpop.eup %2740  ;;  %v1071_v31 = vmul.f32 1.442695, %v1061_v29 }
 0x4a9   :  { %v1086_v35 = vsel %vm722_vm11, %v3362_v30, 0.0 }
 0x4aa   :  { %2742 = vpow2.f32 %v1071_v31  ;;  %1087 = vadd.xlane.f32.xlu0 %v1086_v35 }
 0x4ad   :  { %v1046_v37 = vpop.xlane.xlu1 %1045 }
 0x4ae   :  { %v1062_v38 = vsub.f32 %v984_v50, %v1046_v37 }
 0x4b0   :  { %v3366_v39 = vpop.eup %2742  ;;  %v1073_v40 = vmul.f32 1.442695, %v1062_v38 }
 0x4b1   :  { %v1089_v43 = vsel %vm722_vm11, %v3366_v39, 0.0 }
 0x4b2   :  { %2744 = vpow2.f32 %v1073_v40  ;;  %1090 = vadd.xlane.f32.xlu1 %v1089_v43 }
 0x4b8   :  { %v3370_v46 = vpop.eup %2744 }
 0x4b9   :  { %v1092_v47 = vsel %vm722_vm11, %v3370_v46, 0.0 }
 0x4ba   :  { %1093 = vadd.xlane.f32.xlu0 %v1092_v47 }
 0x4bb   :  { %v1049_v41 = vpop.xlane.xlu1 %1048 }
 0x4bc   :  { %v1063_v53 = vsub.f32 %v1006_v62, %v1049_v41 }
 0x4be   :  { %v1075_v54 = vmul.f32 1.442695, %v1063_v53 }
 0x4c0   :  { %2746 = vpow2.f32 %v1075_v54 }
 0x4c3   :  { %v1052_v57 = vpop.xlane.xlu0 %1051 }
 0x4c4   :  { %v1064_v50 = vsub.f32 %v1008_v4, %v1052_v57 }
 0x4c6   :  { %v3374_v59 = vpop.eup %2746  ;;  %v1077_v60 = vmul.f32 1.442695, %v1064_v50 }
 0x4c7   :  { %v1095_v61 = vsel %vm722_vm11, %v3374_v59, 0.0 }
 0x4c8   :  { %2748 = vpow2.f32 %v1077_v60  ;;  %1096 = vadd.xlane.f32.xlu1 %v1095_v61 }
 0x4ce   :  { %v3378_v1 = vpop.eup %2748 }
 0x4cf   :  { %v1098_v2 = vsel %vm722_vm11, %v3378_v1, 0.0 }
 0x4d0   :  { %1099 = vadd.xlane.f32.xlu0 %v1098_v2 }
 0x4d1   :  { %v1055_v5 = vpop.xlane.xlu0 %1054 }
 0x4d2   :  { %v1065_v62 = vsub.f32 %v1030_v9, %v1055_v5 }
 0x4d3   :  { %v1240_v7 = vpop.permute.xlu1 %1239 }
 0x4d4   :  { %v1079_v10 = vmul.f32 1.442695, %v1065_v62 }
 0x4d6   :  { %2750 = vpow2.f32 %v1079_v10 }
 0x4d9   :  { %v1058_v4 = vpop.xlane.xlu2 %1057 }
 0x4da   :  { %v1066_v34 = vsub.f32 %v1032_v15, %v1058_v4 }
 0x4db   :  { %v1290_v6 = vpop.permute.xlu1 %1289 }
 0x4dc   :  { %v3382_v16 = vpop.eup %2750  ;;  %v1081_v17 = vmul.f32 1.442695, %v1066_v34  ;;  %v1295_v18 = vsel %vm611_vm10, %v1290_v6, 0 }
 0x4dd   :  { %v1101_v19 = vsel %vm722_vm11, %v3382_v16, 0.0 }
 0x4de   :  { %2752 = vpow2.f32 %v1081_v17  ;;  %1102 = vadd.xlane.f32.xlu2 %v1101_v19 }
 0x4e1   :  { %1263 = vrot.lane.b32.xlu1 %v3168_v36, %s3053_s13  ;;  %v1162_v21 = vpop.permute.xlu2 %1161 }
 0x4e2   :  { %1174 = vmatpush.bf16.msra.mxu1 %v1162_v21 }
 0x4e3   :  { %v1266_v9 = vpop.permute.xlu1 %1265 }
 0x4e4   :  { %v3388_v12 = vpop.eup %2752  ;;  %v1271_v25 = vsel %vm611_vm10, %v1266_v9, 0  ;;  %v1187_v15 = vpop.permute.xlu0 %1186 }
 0x4e5   :  { %1199 = vmatpush.bf16.msra.mxu2 %v1187_v15  ;;  %v1104_v28 = vsel %vm722_vm11, %v3388_v12, 0.0 }
 0x4e6   :  { %1280 = vmatpush.bf16.xpose.msrb.mxu1 %v1271_v25  ;;  %1105 = vadd.xlane.f32.xlu0 %v1104_v28 }
 0x4e9   :  { %1304 = vmatpush.bf16.xpose.msrb.mxu2 %v1295_v18  ;;  %1311 = vrot.lane.b32.xlu1 %v3180_v8, %s3053_s13 }
 0x4eb   :  { %v1212_v24 = vpop.permute.xlu1 %1211 }
 0x4ec   :  { %1224 = vmatpush.bf16.msrb.mxu3 %v1212_v24 }
 0x4f1   :  { %1541 = vrot.lane.b32.xlu1 %v3191_v23, %s3065_s10 }
 0x4f6   :  { %1287 = vrot.lane.b32.xlu2 %v3177_v58, %s3053_s13 }
 0x4fa   :  { %1313 = vrot.lane.b32.xlu0 %v3225_v14, %s3053_s13 }
 0x4fe   :  { %1436 = vrot.lane.b32.xlu2 %v3175_v49, %s3053_s13 }
 0x516   :  { %v1085_v29 = vpop.xlane.xlu1 %1084 }
 0x517   :  { %2754 = vrcp.f32 %v1085_v29 }
 0x51d   :  { %v1088_v31 = vpop.xlane.xlu0 %1087  ;;  %v2755_v35 = vpop.eup %2754 }
 0x51e   :  { %2756 = vrcp.f32 %v1088_v31  ;;  %v1115_v37 = vmul.f32 %v2755_v35, %v3358_v26 }
 0x520   :  { %v1123_v40 = vpack.c.bf16 %v1115_v37, %v1115_v37 }
 0x522   :  { %v1133_v41 = vunpack.c.l.b16 %v1123_v40 }
 0x524   :  { %v2757_v38 = vpop.eup %2756 }
 0x525   :  { %v1116_v23 = vmul.f32 %v2757_v38, %v3362_v30  ;;  %v1091_v43 = vpop.xlane.xlu1 %1090 }
 0x526   :  { %2758 = vrcp.f32 %v1091_v43 }
 0x527   :  { %v1124_v47 = vpack.c.bf16 %v1116_v23, %v1116_v23 }
 0x529   :  { %v1134_v53 = vunpack.c.l.b16 %v1124_v47 }
 0x52b   :  { %v1135_v54 = vpack.c.b16 %v1134_v53, %v1133_v41 }
 0x52c   :  { %v2759_v50 = vpop.eup %2758 }
 0x52d   :  { %2512 = vmatmul.msk.bf16.vlgmr.msrb.gmra.mxu0 %vm722_vm11, %v1135_v54  ;;  %v1094_v57 = vpop.xlane.xlu0 %1093  ;;  %v1117_v60 = vmul.f32 %v2759_v50, %v3366_v39 }
 0x52e   :  { %2760 = vrcp.f32 %v1094_v57 }
 0x52f   :  { %v1125_v2 = vpack.c.bf16 %v1117_v60, %v1117_v60 }
 0x531   :  { %v1158_v62 = vunpack.c.l.b16 %v1125_v2 }
 0x534   :  { %v2761_v61 = vpop.eup %2760 }
 0x535   :  { %v1118_v26 = vmul.f32 %v2761_v61, %v3370_v46 }
 0x537   :  { %v1126_v5 = vpack.c.bf16 %v1118_v26, %v1118_v26 }
 0x539   :  { %v1159_v30 = vunpack.c.l.b16 %v1126_v5 }
 0x53b   :  { %v1160_v10 = vpack.c.b16 %v1159_v30, %v1158_v62  ;;  %v1097_v4 = vpop.xlane.xlu1 %1096 }
 0x53c   :  { %2762 = vrcp.f32 %v1097_v4 }
 0x53d   :  { %2513 = vmatmul.msk.bf16.vlgmr.msra.gmra.mxu1 %vm722_vm11, %v1160_v10  ;;  %2516 = vmatmul.msk.bf16.vlgmr.msra.gmra.mxu0 %vm611_vm10, %v1240_v7 }
 0x542   :  { %v2763_v6 = vpop.eup %2762 }
 0x543   :  { %v1100_v34 = vpop.xlane.xlu0 %1099  ;;  %v1119_v17 = vmul.f32 %v2763_v6, %v3374_v59 }
 0x544   :  { %2764 = vrcp.f32 %v1100_v34 }
 0x545   :  { %v1127_v19 = vpack.c.bf16 %v1119_v17, %v1119_v17 }
 0x547   :  { %v1183_v9 = vunpack.c.l.b16 %v1127_v19 }
 0x54a   :  { %v2765_v39 = vpop.eup %2764 }
 0x54b   :  { %v1120_v21 = vmul.f32 %v2765_v39, %v3378_v1 }
 0x54d   :  { %v1128_v46 = vpack.c.bf16 %v1120_v21, %v1120_v21 }
 0x54f   :  { %v1184_v25 = vunpack.c.l.b16 %v1128_v46 }
 0x551   :  { %v1185_v15 = vpack.c.b16 %v1184_v25, %v1183_v9  ;;  %v1103_v18 = vpop.xlane.xlu2 %1102 }
 0x552   :  { %2766 = vrcp.f32 %v1103_v18 }
 0x553   :  { %2514 = vmatmul.msk.bf16.vlgmr.msra.gmra.mxu2 %vm722_vm11, %v1185_v15  ;;  %v1264_v28 = vpop.permute.xlu1 %1263 }
 0x554   :  { %2517 = vmatmul.msk.bf16.vlgmr.msrb.gmra.mxu1 %vm611_vm10, %v1264_v28 }
 0x558   :  { %v2767_v29 = vpop.eup %2766 }
 0x559   :  { %v1106_v7 = vpop.xlane.xlu0 %1105  ;;  %v1288_v24 = vpop.permute.xlu2 %1287  ;;  %v1121_v31 = vmul.f32 %v2767_v29, %v3382_v16 }
 0x55a   :  { %2768 = vrcp.f32 %v1106_v7 }
 0x55b   :  { %v1312_v59 = vpop.permute.xlu1 %1311  ;;  %v1129_v1 = vpack.c.bf16 %v1121_v31, %v1121_v31 }
 0x55d   :  { %v1208_v47 = vunpack.c.l.b16 %v1129_v1 }
 0x560   :  { %v2769_v35 = vpop.eup %2768 }
 0x561   :  { %v1122_v37 = vmul.f32 %v2769_v35, %v3388_v12  ;;  %v1437_v38 = vpop.permute.xlu2 %1436 }
 0x562   :  { %1449 = vmatpush.bf16.msrb.mxu0 %v1437_v38 }
 0x563   :  { %v1130_v40 = vpack.c.bf16 %v1122_v37, %v1122_v37  ;;  %v1542_v23 = vpop.permute.xlu1 %1541  ;;  %2518 = vmatmul.msk.bf16.vlgmr.msrb.gmra.mxu2 %vm611_vm10, %v1288_v24 }
 0x564   :  { %v1547_v43 = vsel %vm611_vm10, %v1542_v23, 0 }
 0x565   :  { %v1209_v41 = vunpack.c.l.b16 %v1130_v40 }
 0x566   :  { %1556 = vmatpush.bf16.xpose.msra.mxu0 %v1547_v43 }
 0x567   :  { %v1210_v53 = vpack.c.b16 %v1209_v41, %v1208_v47 }
 0x569   :  { %2515 = vmatmul.msk.bf16.vlgmr.msrb.gmra.mxu3 %vm722_vm11, %v1210_v53 }
 0x56c   :  { %v1314_v54 = vpop.permute.xlu0 %1313 }
 0x56d   :  { %v1319_v16 = vsel %vm611_vm10, %v1314_v54, 0 }
 0x56e   :  { %1328 = vmatpush.bf16.xpose.msra.mxu3 %v1319_v16 }
 0x579   :  { %2519 = vmatmul.msk.bf16.vlgmr.msra.gmra.mxu3 %vm611_vm10, %v1312_v59 }
 0x5aa   :  { %v1151_v12 = vpop.f32.mrf.mxu0 }
 0x5ab   :  { %v1231_v57 = vpack.c.bf16 %v1151_v12, %v1151_v12 }
 0x5ad   :  { %v3422_v61 = vunpack.c.l.b16 %v1231_v57 }
 0x5b2   :  { %v1153_v50 = vpop.f32.mrf.mxu0 }
 0x5b3   :  { %v1232_v60 = vpack.c.bf16 %v1153_v50, %v1153_v50 }
 0x5b5   :  { %v3424_v2 = vunpack.c.l.b16 %v1232_v60 }
 0x5b7   :  { %v1875_v26 = vpack.c.b16 %v3424_v2, %v3422_v61 }
 0x5ba   :  { %v1176_v5 = vpop.f32.mrf.mxu1  ;;  %v1258_v62 = vpop.f32.mrf.mxu0 }
 0x5bb   :  { %v1335_v30 = vsel %vm722_vm11, %v1258_v62, -inf  ;;  %v1233_v10 = vpack.c.bf16 %v1176_v5, %v1176_v5 }
 0x5bc   :  { %1336 = vmax.xlane.f32.xlu1 %v1335_v30 }
 0x5bd   :  { %v3430_v39 = vunpack.c.l.b16 %v1233_v10 }
 0x5c2   :  { %v1178_v4 = vpop.f32.mrf.mxu1  ;;  %v1260_v34 = vpop.f32.mrf.mxu0 }
 0x5c3   :  { %v1234_v6 = vpack.c.bf16 %v1178_v4, %v1178_v4  ;;  %v1338_v17 = vsel %vm722_vm11, %v1260_v34, -inf }
 0x5c4   :  { %1339 = vmax.xlane.f32.xlu2 %v1338_v17 }
 0x5c5   :  { %v3432_v19 = vunpack.c.l.b16 %v1234_v6 }
 0x5c7   :  { %v1876_v21 = vpack.c.b16 %v3432_v19, %v3430_v39 }
 0x5d1   :  { %v1282_v46 = vpop.f32.mrf.mxu1 }
 0x5d2   :  { %v1341_v9 = vsel %vm722_vm11, %v1282_v46, -inf }
 0x5d3   :  { %1342 = vmax.xlane.f32.xlu0 %v1341_v9 }
 0x5d6   :  { %v1201_v25 = vpop.f32.mrf.mxu2 }
 0x5d7   :  { %v1235_v28 = vpack.c.bf16 %v1201_v25, %v1201_v25 }
 0x5d9   :  { %v1284_v15 = vpop.f32.mrf.mxu1  ;;  %v3438_v29 = vunpack.c.l.b16 %v1235_v28 }
 0x5da   :  { %v1344_v18 = vsel %vm722_vm11, %v1284_v15, -inf }
 0x5db   :  { %1345 = vmax.xlane.f32.xlu1 %v1344_v18 }
 0x5de   :  { %v1203_v7 = vpop.f32.mrf.mxu2 }
 0x5df   :  { %v1236_v24 = vpack.c.bf16 %v1203_v7, %v1203_v7 }
 0x5e1   :  { %v3440_v59 = vunpack.c.l.b16 %v1236_v24 }
 0x5e3   :  { %v1877_v31 = vpack.c.b16 %v3440_v59, %v3438_v29  ;;  %v2574_v29 = vld [vmem:[#allocation10 + $0x50] sm:$0xf]  ;;  %v2637_v59 = vld [vmem:[#allocation10 + $0x54] sm:$0xf0] }
 0x5e6   :  { %v1306_v35 = vpop.f32.mrf.mxu2 }
 0x5e7   :  { %v1347_v1 = vsel %vm722_vm11, %v1306_v35, -inf }
 0x5e8   :  { %1348 = vmax.xlane.f32.xlu2 %v1347_v1 }
 0x5ec   :  { %v1226_v37 = vpop.f32.mrf.mxu3 }
 0x5ed   :  { %v1237_v23 = vpack.c.bf16 %v1226_v37, %v1226_v37 }
 0x5ee   :  { %v1308_v38 = vpop.f32.mrf.mxu2 }
 0x5ef   :  { %v1350_v40 = vsel %vm722_vm11, %v1308_v38, -inf  ;;  %v3446_v41 = vunpack.c.l.b16 %v1237_v23 }
 0x5f0   :  { %1351 = vmax.xlane.f32.xlu1 %v1350_v40 }
 0x5f4   :  { %v1228_v43 = vpop.f32.mrf.mxu3 }
 0x5f5   :  { %v1238_v47 = vpack.c.bf16 %v1228_v43, %v1228_v43 }
 0x5f7   :  { %v3448_v53 = vunpack.c.l.b16 %v1238_v47 }
 0x5f9   :  { %v1878_v54 = vpack.c.b16 %v3448_v53, %v3446_v41  ;;  %v2575_v41 = vor.u32 %v2637_v59, %v2574_v29 }
 0x5fc   :  { %v1330_v16 = vpop.f32.mrf.mxu3 }
 0x5fd   :  { %v1353_v12 = vsel %vm722_vm11, %v1330_v16, -inf }
 0x5fe   :  { %1354 = vmax.xlane.f32.xlu0 %v1353_v12 }
 0x604   :  { %v3453_v57 = vpop.f32.mrf.mxu3 }
 0x605   :  { %v1356_v50 = vsel %vm722_vm11, %v3453_v57, -inf }
 0x606   :  { %1357 = vmax.xlane.f32.xlu2 %v1356_v50 }
 0x61e   :  { %1539 = vrot.lane.b32.xlu2 %v3171_v44, %s3065_s10 }
 0x626   :  { %1486 = vrot.lane.b32.xlu2 %v3187_v20, %s3053_s13 }
 0x62f   :  { %v1337_v60 = vpop.xlane.xlu1 %1336 }
 0x630   :  { %v1359_v5 = vsub.f32 %v1258_v62, %v1337_v60 }
 0x632   :  { %v1367_v30 = vmul.f32 1.442695, %v1359_v5 }
 0x634   :  { %2770 = vpow2.f32 %v1367_v30 }
 0x637   :  { %v1340_v10 = vpop.xlane.xlu2 %1339 }
 0x638   :  { %v1360_v4 = vsub.f32 %v1260_v34, %v1340_v10 }
 0x63a   :  { %v3461_v6 = vpop.eup %2770  ;;  %v1369_v17 = vmul.f32 1.442695, %v1360_v4 }
 0x63b   :  { %v1383_v9 = vsel %vm722_vm11, %v3461_v6, 0.0 }
 0x63c   :  { %2772 = vpow2.f32 %v1369_v17  ;;  %1384 = vadd.xlane.f32.xlu1 %v1383_v9 }
 0x642   :  { %v3465_v25 = vpop.eup %2772 }
 0x643   :  { %v1386_v44 = vsel %vm722_vm11, %v3465_v25, 0.0 }
 0x644   :  { %1387 = vadd.xlane.f32.xlu0 %v1386_v44 }
 0x646   :  { %v1343_v18 = vpop.xlane.xlu0 %1342 }
 0x647   :  { %v1361_v62 = vsub.f32 %v1282_v46, %v1343_v18 }
 0x649   :  { %v1371_v28 = vmul.f32 1.442695, %v1361_v62 }
 0x64b   :  { %2774 = vpow2.f32 %v1371_v28 }
 0x64e   :  { %v1346_v7 = vpop.xlane.xlu1 %1345 }
 0x64f   :  { %v1362_v34 = vsub.f32 %v1284_v15, %v1346_v7 }
 0x651   :  { %v3469_v24 = vpop.eup %2774  ;;  %v1373_v1 = vmul.f32 1.442695, %v1362_v34 }
 0x652   :  { %v1389_v37 = vsel %vm722_vm11, %v3469_v24, 0.0 }
 0x653   :  { %2776 = vpow2.f32 %v1373_v1  ;;  %1390 = vadd.xlane.f32.xlu1 %v1389_v37 }
 0x659   :  { %v3473_v40 = vpop.eup %2776 }
 0x65a   :  { %v1392_v23 = vsel %vm722_vm11, %v3473_v40, 0.0 }
 0x65b   :  { %1393 = vadd.xlane.f32.xlu0 %v1392_v23  ;;  %v1349_v43 = vpop.xlane.xlu2 %1348 }
 0x65c   :  { %v1363_v46 = vsub.f32 %v1306_v35, %v1349_v43 }
 0x65e   :  { %v1375_v47 = vmul.f32 1.442695, %v1363_v46 }
 0x660   :  { %2778 = vpow2.f32 %v1375_v47 }
 0x663   :  { %v1352_v12 = vpop.xlane.xlu1 %1351 }
 0x664   :  { %v1364_v15 = vsub.f32 %v1308_v38, %v1352_v12 }
 0x666   :  { %v2779_v50 = vpop.eup %2778  ;;  %v1377_v60 = vmul.f32 1.442695, %v1364_v15 }
 0x667   :  { %v1395_v5 = vsel %vm722_vm11, %v2779_v50, 0.0 }
 0x668   :  { %2780 = vpow2.f32 %v1377_v60  ;;  %1396 = vadd.xlane.f32.xlu1 %v1395_v5 }
 0x66e   :  { %v2781_v30 = vpop.eup %2780 }
 0x66f   :  { %v1398_v10 = vsel %vm722_vm11, %v2781_v30, 0.0 }
 0x670   :  { %1399 = vadd.xlane.f32.xlu0 %v1398_v10 }
 0x671   :  { %v1355_v4 = vpop.xlane.xlu0 %1354 }
 0x672   :  { %v1365_v17 = vsub.f32 %v1330_v16, %v1355_v4 }
 0x674   :  { %v1379_v9 = vmul.f32 1.442695, %v1365_v17 }
 0x676   :  { %2782 = vpow2.f32 %v1379_v9 }
 0x679   :  { %v1358_v44 = vpop.xlane.xlu2 %1357 }
 0x67c   :  { %v3479_v35 = vpop.eup %2782 }
 0x67d   :  { %v1401_v38 = vsel %vm722_vm11, %v3479_v35, 0.0 }
 0x67e   :  { %1402 = vadd.xlane.f32.xlu2 %v1401_v38 }
 0x681   :  { %1565 = vrot.lane.b32.xlu1 %v3203_v42, %s3065_s10  ;;  %v1540_v18 = vpop.permute.xlu2 %1539  ;;  %v1366_v42 = vsub.f32 %v3453_v57, %v1358_v44 }
 0x683   :  { %v1381_v62 = vmul.f32 1.442695, %v1366_v42 }
 0x684   :  { %1461 = vrot.lane.b32.xlu0 %v3205_v45, %s3053_s13 }
 0x685   :  { %2784 = vpow2.f32 %v1381_v62 }
 0x689   :  { %1589 = vrot.lane.b32.xlu1 %v3214_v56, %s3065_s10  ;;  %v1487_v16 = vpop.permute.xlu2 %1486 }
 0x68a   :  { %1499 = vmatpush.bf16.msra.mxu2 %v1487_v16 }
 0x68b   :  { %v3500_v56 = vpop.eup %2784 }
 0x691   :  { %1563 = vrot.lane.b32.xlu1 %v3168_v36, %s3065_s10  ;;  %v1404_v36 = vsel %vm722_vm11, %v3500_v56, 0.0 }
 0x696   :  { %1613 = vrot.lane.b32.xlu2 %v3225_v14, %s3065_s10 }
 0x699   :  { %1511 = vrot.lane.b32.xlu1 %v3227_v13, %s3053_s13 }
 0x6a1   :  { %1587 = vrot.lane.b32.xlu1 %v3177_v58, %s3065_s10 }
 0x6a9   :  { %1611 = vrot.lane.b32.xlu1 %v3180_v8, %s3065_s10 }
 0x6ae   :  { %1405 = vadd.xlane.f32.xlu0 %v1404_v36 }
 0x6af   :  { %v1385_v14 = vpop.xlane.xlu1 %1384 }
 0x6b0   :  { %2786 = vrcp.f32 %v1385_v14 }
 0x6b6   :  { %v2787_v7 = vpop.eup %2786 }
 0x6b7   :  { %v1388_v28 = vpop.xlane.xlu0 %1387  ;;  %v1415_v57 = vmul.f32 %v2787_v7, %v3461_v6 }
 0x6b8   :  { %2788 = vrcp.f32 %v1388_v28 }
 0x6b9   :  { %v1423_v1 = vpack.c.bf16 %v1415_v57, %v1415_v57 }
 0x6bb   :  { %v1433_v23 = vunpack.c.l.b16 %v1423_v1 }
 0x6be   :  { %v2789_v34 = vpop.eup %2788 }
 0x6bf   :  { %v1416_v58 = vmul.f32 %v2789_v34, %v3465_v25 }
 0x6c1   :  { %v1424_v37 = vpack.c.bf16 %v1416_v58, %v1416_v58 }
 0x6c3   :  { %v1434_v8 = vunpack.c.l.b16 %v1424_v37 }
 0x6c5   :  { %v1435_v43 = vpack.c.b16 %v1434_v8, %v1433_v23 }
 0x6c6   :  { %v1391_v46 = vpop.xlane.xlu1 %1390 }
 0x6c7   :  { %2520 = vmatmul.msk.bf16.vlgmr.msrb.gmra.mxu0 %vm722_vm11, %v1435_v43 }
 0x6ce   :  { %v1394_v47 = vpop.xlane.xlu0 %1393 }
 0x6d7   :  { %2524 = vmatmul.msk.bf16.vlgmr.msra.gmra.mxu0 %vm611_vm10, %v1540_v18 }
 0x6db   :  { %v1397_v12 = vpop.xlane.xlu1 %1396 }
 0x6dc   :  { %2790 = vrcp.f32 %v1397_v12 }
 0x6dd   :  { %2792 = vrcp.f32 %v1394_v47 }
 0x6e2   :  { %v2791_v60 = vpop.eup %2790 }
 0x6e3   :  { %v1400_v15 = vpop.xlane.xlu0 %1399  ;;  %v1419_v6 = vmul.f32 %v2791_v60, %v2779_v50  ;;  %v2793_v5 = vpop.eup %2792 }
 0x6e4   :  { %2794 = vrcp.f32 %v1400_v15  ;;  %v1418_v9 = vmul.f32 %v2793_v5, %v3473_v40 }
 0x6e5   :  { %2796 = vrcp.f32 %v1391_v46  ;;  %v1427_v4 = vpack.c.bf16 %v1419_v6, %v1419_v6 }
 0x6e6   :  { %v1426_v42 = vpack.c.bf16 %v1418_v9, %v1418_v9 }
 0x6e7   :  { %v1483_v18 = vunpack.c.l.b16 %v1427_v4 }
 0x6e8   :  { %v1459_v28 = vunpack.c.l.b16 %v1426_v42 }
 0x6ea   :  { %v2795_v25 = vpop.eup %2794 }
 0x6eb   :  { %v2797_v10 = vpop.eup %2796  ;;  %v1420_v17 = vmul.f32 %v2795_v25, %v2781_v30 }
 0x6ec   :  { %v1417_v38 = vmul.f32 %v2797_v10, %v3469_v24 }
 0x6ed   :  { %v1428_v44 = vpack.c.bf16 %v1420_v17, %v1420_v17 }
 0x6ee   :  { %v1425_v36 = vpack.c.bf16 %v1417_v38, %v1417_v38 }
 0x6ef   :  { %v1484_v16 = vunpack.c.l.b16 %v1428_v44 }
 0x6f0   :  { %v1458_v50 = vunpack.c.l.b16 %v1425_v36 }
 0x6f1   :  { %v1485_v62 = vpack.c.b16 %v1484_v16, %v1483_v18  ;;  %v1403_v34 = vpop.xlane.xlu2 %1402 }
 0x6f2   :  { %v1460_v30 = vpack.c.b16 %v1459_v28, %v1458_v50  ;;  %2798 = vrcp.f32 %v1403_v34 }
 0x6f3   :  { %v1566_v14 = vpop.permute.xlu1 %1565  ;;  %2522 = vmatmul.msk.bf16.vlgmr.msra.gmra.mxu2 %vm722_vm11, %v1485_v62 }
 0x6f4   :  { %v1571_v57 = vsel %vm611_vm10, %v1566_v14, 0 }
 0x6f6   :  { %v1462_v7 = vpop.permute.xlu0 %1461 }
 0x6f7   :  { %1474 = vmatpush.bf16.msra.mxu1 %v1462_v7 }
 0x6f8   :  { %v2799_v46 = vpop.eup %2798 }
 0x6f9   :  { %v1614_v58 = vpop.permute.xlu2 %1613  ;;  %v1421_v47 = vmul.f32 %v2799_v46, %v3479_v35 }
 0x6fa   :  { %2521 = vmatmul.msk.bf16.vlgmr.msra.gmra.mxu1 %vm722_vm11, %v1460_v30  ;;  %v1619_v23 = vsel %vm611_vm10, %v1614_v58, 0 }
 0x6fb   :  { %1580 = vmatpush.bf16.xpose.msrb.mxu1 %v1571_v57  ;;  %v1590_v40 = vpop.permute.xlu1 %1589  ;;  %v1429_v15 = vpack.c.bf16 %v1421_v47, %v1421_v47 }
 0x6fc   :  { %v1595_v24 = vsel %vm611_vm10, %v1590_v40, 0 }
 0x6fd   :  { %1604 = vmatpush.bf16.xpose.msrb.mxu2 %v1595_v24  ;;  %v1508_v5 = vunpack.c.l.b16 %v1429_v15 }
 0x703   :  { %v1564_v1 = vpop.permute.xlu1 %1563 }
 0x70a   :  { %2525 = vmatmul.msk.bf16.vlgmr.msrb.gmra.mxu1 %vm611_vm10, %v1564_v1 }
 0x70b   :  { %v1512_v37 = vpop.permute.xlu1 %1511 }
 0x70c   :  { %1524 = vmatpush.bf16.msrb.mxu3 %v1512_v37 }
 0x710   :  { %1628 = vmatpush.bf16.xpose.msra.mxu3 %v1619_v23 }
 0x713   :  { %v1588_v8 = vpop.permute.xlu1 %1587 }
 0x714   :  { %2526 = vmatmul.msk.bf16.vlgmr.msrb.gmra.mxu2 %vm611_vm10, %v1588_v8 }
 0x71b   :  { %v1612_v4 = vpop.permute.xlu1 %1611 }
 0x721   :  { %v1406_v43 = vpop.xlane.xlu0 %1405 }
 0x722   :  { %2800 = vrcp.f32 %v1406_v43 }
 0x728   :  { %v2801_v12 = vpop.eup %2800 }
 0x729   :  { %v1422_v60 = vmul.f32 %v2801_v12, %v3500_v56 }
 0x72b   :  { %v1430_v6 = vpack.c.bf16 %v1422_v60, %v1422_v60 }
 0x72d   :  { %v1509_v25 = vunpack.c.l.b16 %v1430_v6 }
 0x72f   :  { %v1510_v10 = vpack.c.b16 %v1509_v25, %v1508_v5 }
 0x731   :  { %2523 = vmatmul.msk.bf16.vlgmr.msrb.gmra.mxu3 %vm722_vm11, %v1510_v10 }
 0x741   :  { %2527 = vmatmul.msk.bf16.vlgmr.msra.gmra.mxu3 %vm611_vm10, %v1612_v4 }
 0x744   :  { %v1451_v17 = vpop.f32.mrf.mxu0 }
 0x745   :  { %v1531_v9 = vpack.c.bf16 %v1451_v17, %v1451_v17 }
 0x747   :  { %v3521_v18 = vunpack.c.l.b16 %v1531_v9 }
 0x74c   :  { %v1453_v44 = vpop.f32.mrf.mxu0 }
 0x74d   :  { %v1532_v38 = vpack.c.bf16 %v1453_v44, %v1453_v44 }
 0x74f   :  { %v3523_v35 = vunpack.c.l.b16 %v1532_v38 }
 0x751   :  { %v1903_v56 = vpack.c.b16 %v3523_v35, %v3521_v18 }
 0x754   :  { %v1558_v16 = vpop.f32.mrf.mxu0 }
 0x755   :  { %v1635_v42 = vsel %vm722_vm11, %v1558_v16, -inf }
 0x756   :  { %1636 = vmax.xlane.f32.xlu0 %v1635_v42 }
 0x75c   :  { %v1560_v62 = vpop.f32.mrf.mxu0 }
 0x75d   :  { %v1638_v36 = vsel %vm722_vm11, %v1560_v62, -inf }
 0x75e   :  { %1639 = vmax.xlane.f32.xlu1 %v1638_v36 }
 0x776   :  { %v1501_v14 = vpop.f32.mrf.mxu2 }
 0x777   :  { %v1476_v28 = vpop.f32.mrf.mxu1  ;;  %v1535_v50 = vpack.c.bf16 %v1501_v14, %v1501_v14 }
 0x778   :  { %v1533_v7 = vpack.c.bf16 %v1476_v28, %v1476_v28 }
 0x779   :  { %v3529_v34 = vunpack.c.l.b16 %v1535_v50 }
 0x77a   :  { %v3533_v58 = vunpack.c.l.b16 %v1533_v7 }
 0x77e   :  { %v1503_v57 = vpop.f32.mrf.mxu2 }
 0x77f   :  { %v1536_v30 = vpack.c.bf16 %v1503_v57, %v1503_v57  ;;  %v1478_v40 = vpop.f32.mrf.mxu1 }
 0x780   :  { %v1534_v24 = vpack.c.bf16 %v1478_v40, %v1478_v40 }
 0x781   :  { %v3531_v1 = vunpack.c.l.b16 %v1536_v30 }
 0x782   :  { %v3535_v37 = vunpack.c.l.b16 %v1534_v24 }
 0x783   :  { %v1905_v23 = vpack.c.b16 %v3531_v1, %v3529_v34 }
 0x784   :  { %v1904_v8 = vpack.c.b16 %v3535_v37, %v3533_v58  ;;  %v2582_v58 = vld [vmem:[#allocation10 + $0x60] sm:$0xf]  ;;  %v2639_v37 = vld [vmem:[#allocation10 + $0x64] sm:$0xf0] }
 0x787   :  { %v1582_v43 = vpop.f32.mrf.mxu1 }
 0x788   :  { %v1641_v46 = vsel %vm722_vm11, %v1582_v43, -inf }
 0x789   :  { %1642 = vmax.xlane.f32.xlu0 %v1641_v46 }
 0x78f   :  { %v1584_v47 = vpop.f32.mrf.mxu1 }
 0x790   :  { %v1644_v12 = vsel %vm722_vm11, %v1584_v47, -inf }
 0x791   :  { %1645 = vmax.xlane.f32.xlu0 %v1644_v12 }
 0x797   :  { %v1606_v15 = vpop.f32.mrf.mxu2 }
 0x798   :  { %v1647_v60 = vsel %vm722_vm11, %v1606_v15, -inf }
 0x799   :  { %1648 = vmax.xlane.f32.xlu2 %v1647_v60 }
 0x79f   :  { %v1608_v44 = vpop.f32.mrf.mxu2 }
 0x7a0   :  { %v1650_v38 = vsel %vm722_vm11, %v1608_v44, -inf }
 0x7a5   :  { %1736 = vrot.lane.b32.xlu0 %v3175_v49, %s3065_s10 }
 0x7b4   :  { %v1526_v6 = vpop.f32.mrf.mxu3 }
 0x7b5   :  { %v1537_v5 = vpack.c.bf16 %v1526_v6, %v1526_v6 }
 0x7b7   :  { %v3546_v4 = vunpack.c.l.b16 %v1537_v5 }
 0x7bc   :  { %v1528_v25 = vpop.f32.mrf.mxu3 }
 0x7bd   :  { %v1538_v10 = vpack.c.bf16 %v1528_v25, %v1528_v25 }
 0x7bf   :  { %v3548_v17 = vunpack.c.l.b16 %v1538_v10 }
 0x7c1   :  { %v1906_v9 = vpack.c.b16 %v3548_v17, %v3546_v4  ;;  %v1993_v17 = vld [vmem:[%s3723_s5] sm:$0x3]  ;;  %s3066_s5 = smov [#allocation11]  }
 0x7c4   :  { %v1630_v42 = vpop.f32.mrf.mxu3 }
 0x7c5   :  { %v1653_v7 = vsel %vm722_vm11, %v1630_v42, -inf }
 0x7c9   :  { %v1637_v14 = vpop.xlane.xlu0 %1636 }
 0x7ca   :  { %v1659_v50 = vsub.f32 %v1558_v16, %v1637_v14 }
 0x7cc   :  { %v1667_v57 = vmul.f32 1.442695, %v1659_v50  ;;  %v1632_v30 = vpop.f32.mrf.mxu3 }
 0x7cd   :  { %v1656_v46 = vsel %vm722_vm11, %v1632_v30, -inf }
 0x7cf   :  { %1651 = vmax.xlane.f32.xlu0 %v1650_v38 }
 0x7d1   :  { %v1640_v36 = vpop.xlane.xlu1 %1639 }
 0x7d2   :  { %v1660_v28 = vsub.f32 %v1560_v62, %v1640_v36 }
 0x7d4   :  { %v1669_v49 = vmul.f32 1.442695, %v1660_v28 }
 0x7d6   :  { %2802 = vpow2.f32 %v1669_v49 }
 0x7d7   :  { %1654 = vmax.xlane.f32.xlu0 %v1653_v7  ;;  %2804 = vpow2.f32 %v1667_v57 }
 0x7dc   :  { %v2803_v40 = vpop.eup %2802 }
 0x7dd   :  { %v1686_v24 = vsel %vm722_vm11, %v2803_v40, 0.0  ;;  %v2805_v12 = vpop.eup %2804 }
 0x7de   :  { %1687 = vadd.xlane.f32.xlu1 %v1686_v24  ;;  %v1683_v60 = vsel %vm722_vm11, %v2805_v12, 0.0 }
 0x7df   :  { %1657 = vmax.xlane.f32.xlu0 %v1656_v46 }
 0x7e7   :  { %1684 = vadd.xlane.f32.xlu0 %v1683_v60 }
 0x7fb   :  { %1786 = vrot.lane.b32.xlu0 %v3187_v20, %s3065_s10 }
 0x7fc   :  { %v1643_v16 = vpop.xlane.xlu0 %1642 }
 0x7fd   :  { %v1661_v62 = vsub.f32 %v1582_v43, %v1643_v16 }
 0x7ff   :  { %v1671_v6 = vmul.f32 1.442695, %v1661_v62 }
 0x801   :  { %2806 = vpow2.f32 %v1671_v6 }
 0x804   :  { %v1646_v5 = vpop.xlane.xlu0 %1645 }
 0x805   :  { %v1662_v25 = vsub.f32 %v1584_v47, %v1646_v5 }
 0x807   :  { %v3559_v10 = vpop.eup %2806  ;;  %v1673_v38 = vmul.f32 1.442695, %v1662_v25 }
 0x808   :  { %v1689_v36 = vsel %vm722_vm11, %v3559_v10, 0.0 }
 0x809   :  { %2808 = vpow2.f32 %v1673_v38  ;;  %1690 = vadd.xlane.f32.xlu1 %v1689_v36 }
 0x80c   :  { %v1649_v14 = vpop.xlane.xlu2 %1648 }
 0x80d   :  { %v1663_v28 = vsub.f32 %v1606_v15, %v1649_v14 }
 0x80f   :  { %v2809_v49 = vpop.eup %2808  ;;  %v1675_v50 = vmul.f32 1.442695, %v1663_v28 }
 0x810   :  { %v1692_v20 = vsel %vm722_vm11, %v2809_v49, 0.0 }
 0x811   :  { %2810 = vpow2.f32 %v1675_v50  ;;  %1693 = vadd.xlane.f32.xlu2 %v1692_v20 }
 0x817   :  { %v3564_v43 = vpop.eup %2810  ;;  %v1737_v7 = vpop.permute.xlu0 %1736 }
 0x818   :  { %1749 = vmatpush.bf16.msrb.mxu0 %v1737_v7  ;;  %v1695_v47 = vsel %vm722_vm11, %v3564_v43, 0.0 }
 0x819   :  { %1696 = vadd.xlane.f32.xlu1 %v1695_v47 }
 0x832   :  { %1761 = vrot.lane.b32.xlu1 %v3205_v45, %s3065_s10 }
 0x83a   :  { %1879 = vrot.lane.b32.xlu1 %v1875_v26, %s3065_s10 }
 0x842   :  { %v1652_v15 = vpop.xlane.xlu0 %1651  ;;  %1907 = vrot.lane.b32.xlu1 %v1903_v56, %s3053_s13 }
 0x843   :  { %v1664_v57 = vsub.f32 %v1608_v44, %v1652_v15 }
 0x845   :  { %v1677_v24 = vmul.f32 1.442695, %v1664_v57 }
 0x847   :  { %2812 = vpow2.f32 %v1677_v24 }
 0x84a   :  { %v1655_v46 = vpop.xlane.xlu0 %1654  ;;  %1881 = vrot.lane.b32.xlu1 %v1876_v21, %s3065_s10 }
 0x84b   :  { %v1665_v45 = vsub.f32 %v1630_v42, %v1655_v46 }
 0x84d   :  { %v2813_v60 = vpop.eup %2812  ;;  %v1679_v16 = vmul.f32 1.442695, %v1665_v45 }
 0x84e   :  { %v1698_v61 = vsel %vm722_vm11, %v2813_v60, 0.0 }
 0x84f   :  { %2814 = vpow2.f32 %v1679_v16  ;;  %1699 = vadd.xlane.f32.xlu2 %v1698_v61 }
 0x851   :  { %v1688_v2 = vpop.xlane.xlu1 %1687 }
 0x852   :  { %v1658_v26 = vpop.xlane.xlu0 %1657  ;;  %2816 = vrcp.f32 %v1688_v2 }
 0x853   :  { %v1666_v18 = vsub.f32 %v1632_v30, %v1658_v26 }
 0x855   :  { %v2815_v35 = vpop.eup %2814  ;;  %v1681_v56 = vmul.f32 1.442695, %v1666_v18 }
 0x856   :  { %v1701_v44 = vsel %vm722_vm11, %v2815_v35, 0.0 }
 0x857   :  { %2818 = vpow2.f32 %v1681_v56  ;;  %1702 = vadd.xlane.f32.xlu2 %v1701_v44 }
 0x858   :  { %v2817_v39 = vpop.eup %2816 }
 0x859   :  { %v1716_v21 = vmul.f32 %v2817_v39, %v2803_v40 }
 0x85a   :  { %v1685_v62 = vpop.xlane.xlu0 %1684 }
 0x85b   :  { %2820 = vrcp.f32 %v1685_v62  ;;  %v1724_v5 = vpack.c.bf16 %v1716_v21, %v1716_v21 }
 0x85d   :  { %v2819_v19 = vpop.eup %2818  ;;  %v1734_v30 = vunpack.c.l.b16 %v1724_v5 }
 0x85e   :  { %v1704_v42 = vsel %vm722_vm11, %v2819_v19, 0.0 }
 0x85f   :  { %1705 = vadd.xlane.f32.xlu0 %v1704_v42 }
 0x861   :  { %v2821_v6 = vpop.eup %2820 }
 0x862   :  { %v1715_v25 = vmul.f32 %v2821_v6, %v2805_v12 }
 0x864   :  { %v1723_v38 = vpack.c.bf16 %v1715_v25, %v1715_v25 }
 0x866   :  { %v1733_v36 = vunpack.c.l.b16 %v1723_v38 }
 0x868   :  { %v1735_v14 = vpack.c.b16 %v1734_v30, %v1733_v36 }
 0x86a   :  { %2528 = vmatmul.msk.bf16.vlgmr.msrb.gmra.mxu0 %vm722_vm11, %v1735_v14 }
 0x86d   :  { %v1787_v28 = vpop.permute.xlu0 %1786 }
 0x86e   :  { %1799 = vmatpush.bf16.msra.mxu2 %v1787_v28 }
 0x86f   :  { %1811 = vrot.lane.b32.xlu2 %v3227_v13, %s3065_s10 }
 0x873   :  { %1911 = vrot.lane.b32.xlu0 %v1905_v23, %s3053_s13 }
 0x87c   :  { %v1691_v50 = vpop.xlane.xlu1 %1690 }
 0x884   :  { %v1694_v40 = vpop.xlane.xlu2 %1693 }
 0x885   :  { %2822 = vrcp.f32 %v1694_v40 }
 0x886   :  { %2824 = vrcp.f32 %v1691_v50 }
 0x88b   :  { %v2823_v12 = vpop.eup %2822 }
 0x88c   :  { %v2825_v20 = vpop.eup %2824  ;;  %v1718_v7 = vmul.f32 %v2823_v12, %v2809_v49  ;;  %v1697_v15 = vpop.xlane.xlu1 %1696 }
 0x88d   :  { %v1717_v47 = vmul.f32 %v2825_v20, %v3559_v10  ;;  %2826 = vrcp.f32 %v1697_v15  ;;  %v2592_v15 = vld [vmem:[#allocation10 + $0x78] sm:$0xf0] }
 0x88e   :  { %v1726_v57 = vpack.c.bf16 %v1718_v7, %v1718_v7  ;;  %v2640_v7 = vld [vmem:[#allocation10 + $0x74] sm:$0xf] }
 0x88f   :  { %v1725_v24 = vpack.c.bf16 %v1717_v47, %v1717_v47 }
 0x890   :  { %v1759_v46 = vunpack.c.l.b16 %v1726_v57  ;;  %v2595_v57 = vor.u32 %v2640_v7, %v2592_v15 }
 0x891   :  { %v1758_v45 = vunpack.c.l.b16 %v1725_v24  ;;  %v2583_v24 = vor.u32 %v2639_v37, %v2582_v58 }
 0x893   :  { %v1760_v16 = vpack.c.b16 %v1759_v46, %v1758_v45  ;;  %v2827_v1 = vpop.eup %2826  ;;  %v2584_v46 = vld [vmem:[#allocation10 + $0x68] sm:$0xf0]  ;;  %v2636_v45 = vld [vmem:[#allocation10 + $0x54] sm:$0xf] }
 0x894   :  { %v1719_v23 = vmul.f32 %v2827_v1, %v3564_v43  ;;  %v2568_v1 = vld [vmem:[#allocation10 + $0x48] sm:$0xf0] }
 0x896   :  { %v1727_v49 = vpack.c.bf16 %v1719_v23, %v1719_v23 }
 0x898   :  { %v1783_v18 = vunpack.c.l.b16 %v1727_v49  ;;  %v2558_v49 = vld [vmem:[#allocation10 + $0x30] sm:$0xf] }
 0x8a4   :  { %v1762_v13 = vpop.permute.xlu1 %1761 }
 0x8a5   :  { %1774 = vmatpush.bf16.msra.mxu1 %v1762_v13  ;;  %v2576_v13 = vld [vmem:[#allocation10 + $0x58] sm:$0xf0] }
 0x8a6   :  { %v2579_v53 = vor.u32 %v2636_v45, %v2576_v13 }
 0x8a8   :  { %2529 = vmatmul.msk.bf16.vlgmr.msra.gmra.mxu1 %vm722_vm11, %v1760_v16  ;;  %v2635_v16 = vld [vmem:[#allocation10 + $0x44] sm:$0xf0] }
 0x8a9   :  { %2108 = vmatpush.bf16.msrb.mxu1 %v2595_v57 }
 0x8ac   :  { %v1880_v58 = vpop.permute.xlu1 %1879 }
 0x8b4   :  { %v1908_v37 = vpop.permute.xlu1 %1907 }
 0x8c2   :  { %v1700_v34 = vpop.xlane.xlu2 %1699 }
 0x8c3   :  { %2828 = vrcp.f32 %v1700_v34  ;;  %v2634_v34 = vld [vmem:[#allocation10 + $0x44] sm:$0xf] }
 0x8c9   :  { %v2829_v61 = vpop.eup %2828 }
 0x8ca   :  { %v1720_v2 = vmul.f32 %v2829_v61, %v2813_v60  ;;  %v1703_v10 = vpop.xlane.xlu2 %1702  ;;  %v2571_v61 = vor.u32 %v2634_v34, %v2568_v1 }
 0x8cb   :  { %2830 = vrcp.f32 %v1703_v10  ;;  %v2632_v10 = vld [vmem:[#allocation10 + $0x34] sm:$0xf] }
 0x8cc   :  { %v1728_v26 = vpack.c.bf16 %v1720_v2, %v1720_v2  ;;  %v2633_v2 = vld [vmem:[#allocation10 + $0x34] sm:$0xf0] }
 0x8ce   :  { %v1784_v56 = vunpack.c.l.b16 %v1728_v26  ;;  %v2560_v26 = vld [vmem:[#allocation10 + $0x38] sm:$0xf0] }
 0x8d0   :  { %v1785_v44 = vpack.c.b16 %v1784_v56, %v1783_v18  ;;  %v2559_v18 = vor.u32 %v2633_v2, %v2558_v49  ;;  %v2563_v56 = vor.u32 %v2632_v10, %v2560_v26 }
 0x8d1   :  { %v2831_v21 = vpop.eup %2830 }
 0x8d2   :  { %v1706_v62 = vpop.xlane.xlu0 %1705  ;;  %2530 = vmatmul.msk.bf16.vlgmr.msra.gmra.mxu2 %vm722_vm11, %v1785_v44  ;;  %v1812_v39 = vpop.permute.xlu2 %1811  ;;  %v1721_v42 = vmul.f32 %v2831_v21, %v2815_v35  ;;  %v2590_v35 = vld [vmem:[#allocation10 + $0x70] sm:$0xf]  ;;  %v2550_v44 = vld [vmem:[#allocation10 + $0x20] sm:$0xf]  ;;  %v2552_v21 = vld [vmem:[#allocation10 + $0x28] sm:$0xf0] }
 0x8d3   :  { %2832 = vrcp.f32 %v1706_v62  ;;  %1824 = vmatpush.bf16.msrb.mxu3 %v1812_v39  ;;  %v2631_v62 = vld [vmem:[#allocation10 + $0x24] sm:$0xf0]  ;;  %v2630_v39 = vld [vmem:[#allocation10 + $0x24] sm:$0xf] }
 0x8d4   :  { %v1729_v5 = vpack.c.bf16 %v1721_v42, %v1721_v42  ;;  %v2551_v42 = vor.u32 %v2631_v62, %v2550_v44 }
 0x8d6   :  { %v1808_v38 = vunpack.c.l.b16 %v1729_v5  ;;  %v2542_v5 = vld [vmem:[#allocation10 + $0x10] sm:$0xf] }
 0x8d9   :  { %v2833_v6 = vpop.eup %2832 }
 0x8da   :  { %v1722_v43 = vmul.f32 %v2833_v6, %v2819_v19  ;;  %v2641_v19 = vld [vmem:[#allocation10 + $0x74] sm:$0xf0]  ;;  %v2555_v6 = vor.u32 %v2630_v39, %v2552_v21  ;;  %v3644_v39 = vld [vmem:[%s3724_s6] ss:$0 sm:$0xff]  ;;  %s2333_s6 = sshll.u32 %s3066_s5, 4  ;;  %s2334_s6 = int_to_ptr.vmem [resolvable:$true] %s2333_s6 }
 0x8db   :  { %v2591_v47 = vor.u32 %v2641_v19, %v2590_v35 }
 0x8dc   :  { %v1730_v25 = vpack.c.bf16 %v1722_v43, %v1722_v43  ;;  %v2629_v43 = vld [vmem:[#allocation10 + $0x14] sm:$0xf0] }
 0x8dd   :  { %2079 = vmatpush.bf16.msra.mxu0 %v2591_v47 }
 0x8de   :  { %v1809_v60 = vunpack.c.l.b16 %v1730_v25 }
 0x8e0   :  { %v1810_v30 = vpack.c.b16 %v1809_v60, %v1808_v38  ;;  %v2628_v38 = vld [vmem:[#allocation10 + $0x14] sm:$0xf]  ;;  %v2544_v60 = vld [vmem:[#allocation10 + $0x18] sm:$0xf0] }
 0x8e1   :  { %2080 = vmatpush.bf16.msra.mxu0 %v2583_v24 }
 0x8e2   :  { %2531 = vmatmul.msk.bf16.vlgmr.msrb.gmra.mxu3 %vm722_vm11, %v1810_v30  ;;  %v2543_v30 = vor.u32 %v2629_v43, %v2542_v5 }
 0x8e5   :  { %2081 = vmatpush.bf16.msra.mxu0 %v2575_v41  ;;  %v1912_v62 = vpop.permute.xlu0 %1911 }
 0x8e7   :  { %v1751_v36 = vpop.f32.mrf.mxu0 }
 0x8e8   :  { %v1831_v14 = vpack.c.bf16 %v1751_v36, %v1751_v36  ;;  %v2547_v36 = vor.u32 %v2628_v38, %v2544_v60 }
 0x8ea   :  { %v1923_v50 = vunpack.c.l.b16 %v1831_v14  ;;  %v2534_v14 = vld [vmem:[#allocation10] sm:$0xf] }
 0x8ef   :  { %v1753_v28 = vpop.f32.mrf.mxu0 }
 0x8f0   :  { %v1832_v40 = vpack.c.bf16 %v1753_v28, %v1753_v28  ;;  %v2627_v28 = vld [vmem:[#allocation10 + $0x4] sm:$0xf0] }
 0x8f2   :  { %v1924_v12 = vunpack.c.l.b16 %v1832_v40  ;;  %v2626_v40 = vld [vmem:[#allocation10 + $0x4] sm:$0xf] }
 0x8f4   :  { %v1931_v20 = vpack.c.b16 %v1924_v12, %v1923_v50  ;;  %v2536_v50 = vld [vmem:[#allocation10 + $0x8] sm:$0xf0]  ;;  %v2535_v12 = vor.u32 %v2627_v28, %v2534_v14 }
 0x8f5   :  { %v2539_v35 = vor.u32 %v2626_v40, %v2536_v50 }
 0x8f6   :  { %1935 = vrot.lane.b32.xlu2 %v1931_v20, %s3064_s4 }
 0x8fe   :  { %1909 = vrot.lane.b32.xlu2 %v1904_v8, %s3053_s13  ;;  %v2638_v8 = vld [vmem:[#allocation10 + $0x64] sm:$0xf] }
 0x906   :  { %1883 = vrot.lane.b32.xlu2 %v1877_v31, %s3065_s10  ;;  %v2587_v31 = vor.u32 %v2638_v8, %v2584_v46  ;;  %v1945_v8 = vsel %vm611_vm10, %v1855_v33, %v1880_v58 }
 0x907   :  { %v1957_v24 = vsel %vm1955_vm12, %v1945_v8, %v1908_v37 }
 0x908   :  { %2109 = vmatpush.bf16.msrb.mxu1 %v2587_v31 }
 0x90c   :  { %2110 = vmatpush.bf16.msrb.mxu1 %v2579_v53 }
 0x90e   :  { %1885 = vrot.lane.b32.xlu2 %v1878_v54, %s3065_s10  ;;  %v2566_v54 = vld [vmem:[#allocation10 + $0x40] sm:$0xf] }
 0x90f   :  { %v2567_v23 = vor.u32 %v2635_v16, %v2566_v54 }
 0x910   :  { %2111 = vmatpush.bf16.msrb.mxu1 %v2571_v61  ;;  %v1882_v61 = vpop.permute.xlu1 %1881 }
 0x911   :  { %2082 = vmatpush.bf16.msra.mxu0 %v2567_v23  ;;  %v1948_v2 = vsel %vm611_vm10, %v1856_v52, %v1882_v61  ;;  %v3639_v52 = vperm.slane %v1993_v17, 0 }
 0x914   :  { %2112 = vmatpush.bf16.msrb.mxu1 %v2563_v56 }
 0x915   :  { %2083 = vmatpush.bf16.msra.mxu0 %v2559_v18 }
 0x918   :  { %2113 = vmatpush.bf16.msrb.mxu1 %v2555_v6 }
 0x919   :  { %2084 = vmatpush.bf16.msra.mxu0 %v2551_v42 }
 0x91c   :  { %2114 = vmatpush.bf16.msrb.mxu1 %v2547_v36 }
 0x91d   :  { %2085 = vmatpush.bf16.msra.mxu0 %v2543_v30 }
 0x920   :  { %2115 = vmatpush.bf16.msrb.mxu1 %v2539_v35 }
 0x921   :  { %2086 = vmatpush.bf16.msra.mxu0 %v2535_v12 }
 0x925   :  { %v1776_v25 = vpop.f32.mrf.mxu1 }
 0x926   :  { %v1833_v20 = vpack.c.bf16 %v1776_v25, %v1776_v25 }
 0x928   :  { %v1925_v47 = vunpack.c.l.b16 %v1833_v20 }
 0x92d   :  { %v1778_v19 = vpop.f32.mrf.mxu1 }
 0x92e   :  { %v1834_v7 = vpack.c.bf16 %v1778_v19, %v1778_v19 }
 0x930   :  { %v1926_v15 = vunpack.c.l.b16 %v1834_v7 }
 0x932   :  { %v1932_v57 = vpack.c.b16 %v1926_v15, %v1925_v47 }
 0x934   :  { %1937 = vrot.lane.b32.xlu1 %v1932_v57, %s3064_s4 }
 0x950   :  { %v1936_v46 = vpop.permute.xlu2 %1935 }
 0x951   :  { %v1966_v29 = vsel %vm1964_vm13, %v1957_v24, %v1936_v46 }
 0x952   :  { %2087 = vmatmul.bf16.vlgmr.msra.gmra.mxu0 %v1966_v29  ;;  %2116 = vmatmul.bf16.vlgmr.msrb.gmra.mxu1 %v1966_v29 }
 0x955   :  { %v1801_v59 = vpop.f32.mrf.mxu2 }
 0x956   :  { %v1835_v31 = vpack.c.bf16 %v1801_v59, %v1801_v59 }
 0x958   :  { %v1927_v41 = vunpack.c.l.b16 %v1835_v31  ;;  %v1910_v49 = vpop.permute.xlu2 %1909 }
 0x959   :  { %v1959_v10 = vsel %vm1955_vm12, %v1948_v2, %v1910_v49 }
 0x95d   :  { %v1803_v45 = vpop.f32.mrf.mxu2 }
 0x95e   :  { %v1836_v13 = vpack.c.bf16 %v1803_v45, %v1803_v45 }
 0x960   :  { %v1928_v53 = vunpack.c.l.b16 %v1836_v13  ;;  %v1884_v44 = vpop.permute.xlu2 %1883 }
 0x961   :  { %v1951_v51 = vsel %vm611_vm10, %v1857_v0, %v1884_v44 }
 0x962   :  { %v1933_v54 = vpack.c.b16 %v1928_v53, %v1927_v41  ;;  %v1961_v42 = vsel %vm1955_vm12, %v1951_v51, %v1912_v62 }
 0x964   :  { %1939 = vrot.lane.b32.xlu1 %v1933_v54, %s3064_s4 }
 0x965   :  { %v1826_v16 = vpop.f32.mrf.mxu3 }
 0x966   :  { %v1837_v27 = vpack.c.bf16 %v1826_v16, %v1826_v16 }
 0x968   :  { %v1929_v34 = vunpack.c.l.b16 %v1837_v27  ;;  %v1886_v30 = vpop.permute.xlu2 %1885 }
 0x969   :  { %v1954_v40 = vsel %vm611_vm10, %v1858_v22, %v1886_v30 }
 0x96c   :  { %1913 = vrot.lane.b32.xlu1 %v1906_v9, %s3053_s13  ;;  %v3632_v9 = vperm.slane %v1993_v17, 1 }
 0x96d   :  { %v1828_v32 = vpop.f32.mrf.mxu3 }
 0x96e   :  { %v1838_v33 = vpack.c.bf16 %v1828_v32, %v1828_v32 }
 0x970   :  { %v1930_v1 = vunpack.c.l.b16 %v1838_v33 }
 0x972   :  { %v1934_v23 = vpack.c.b16 %v1930_v1, %v1929_v34 }
 0x974   :  { %1941 = vrot.lane.b32.xlu2 %v1934_v23, %s3064_s4 }
 0x9a6   :  { %v1938_v26 = vpop.permute.xlu1 %1937 }
 0x9a7   :  { %v1969_v4 = vsel %vm1964_vm13, %v1959_v10, %v1938_v26 }
 0x9a8   :  { %2092 = vmatmul.bf16.gmra.mxu0 %v1969_v4  ;;  %2121 = vmatmul.bf16.gmra.mxu1 %v1969_v4 }
 0x9ce   :  { %v1942_v12 = vpop.permute.xlu2 %1941 }
 0x9cf   :  { %v2088_v18 = vpop.f32.mrf.mxu0  ;;  %v2117_v56 = vpop.f32.mrf.mxu1 }
 0x9d0   :  { %v2118_v48 = vadd.f32 %v2117_v56, %v3632_v9  ;;  %v3649_v55 = vadd.f32 %v2088_v18, %v3639_v52 }
 0x9d2   :  { %2834 = vtanh.f32 %v2118_v48 }
 0x9d6   :  { %v1940_v21 = vpop.permute.xlu1 %1939 }
 0x9d7   :  { %v2090_v6 = vpop.f32.mrf.mxu0  ;;  %v2119_v5 = vpop.f32.mrf.mxu1  ;;  %v1972_v43 = vsel %vm1964_vm13, %v1961_v42, %v1940_v21 }
 0x9d8   :  { %v2835_v25 = vpop.eup %2834  ;;  %v3652_v63 = vadd.f32 %v2090_v6, %v3639_v52  ;;  %v2120_v0 = vadd.f32 %v2119_v5, %v3632_v9  ;;  %2097 = vmatmul.bf16.gmra.mxu0 %v1972_v43  ;;  %2126 = vmatmul.bf16.gmra.mxu1 %v1972_v43 }
 0x9d9   :  { %v2165_v38 = vmul.f32 %v2835_v25, %v3644_v39 }
 0x9da   :  { %v2645_v60 = vpack.c.bf16 %v3652_v63, %v3649_v55  ;;  %2836 = vtanh.f32 %v2120_v0 }
 0x9db   :  { %2173 = vadd.xlane.f32.xlu0 %v2165_v38 }
 0x9dc   :  { %2646 = vst [vmem:[#allocation11] sm:$0xff] %v2645_v60  }
 0x9de   :  { %v1914_v14 = vpop.permute.xlu1 %1913 }
 0x9df   :  { %v1963_v50 = vsel %vm1955_vm12, %v1954_v40, %v1914_v14 }
 0x9e0   :  { %v2837_v36 = vpop.eup %2836  ;;  %v1975_v20 = vsel %vm1964_vm13, %v1963_v50, %v1942_v12 }
 0x9e1   :  { %v2166_v28 = vmul.f32 %v2837_v36, %v3644_v39 }
 0x9e3   :  { %2175 = vadd.xlane.f32.xlu1 %v2166_v28 }
 0x9e8   :  { %2102 = vmatmul.bf16.gmra.mxu0 %v1975_v20  ;;  %2131 = vmatmul.bf16.gmra.mxu1 %v1975_v20 }
 0xa25   :  { %v2093_v35 = vpop.f32.mrf.mxu0  ;;  %v2122_v19 = vpop.f32.mrf.mxu1 }
 0xa26   :  { %v2123_v7 = vadd.f32 %v2122_v19, %v3632_v9  ;;  %v3667_v11 = vadd.f32 %v2093_v35, %v3639_v52 }
 0xa28   :  { %2838 = vtanh.f32 %v2123_v7 }
 0xa2d   :  { %v2095_v47 = vpop.f32.mrf.mxu0  ;;  %v2124_v15 = vpop.f32.mrf.mxu1 }
 0xa2e   :  { %v2839_v57 = vpop.eup %2838  ;;  %v3670_v3 = vadd.f32 %v2095_v47, %v3639_v52  ;;  %v2125_v22 = vadd.f32 %v2124_v15, %v3632_v9 }
 0xa2f   :  { %v2167_v58 = vmul.f32 %v2839_v57, %v3644_v39 }
 0xa30   :  { %v2650_v37 = vpack.c.bf16 %v3670_v3, %v3667_v11  ;;  %2840 = vtanh.f32 %v2125_v22 }
 0xa31   :  { %2177 = vadd.xlane.f32.xlu2 %v2167_v58 }
 0xa32   :  { %2662 = vst [vmem:[#allocation11 + $0x8] sm:$0xff] %v2650_v37  }
 0xa36   :  { %v2841_v8 = vpop.eup %2840 }
 0xa37   :  { %v2168_v24 = vmul.f32 %v2841_v8, %v3644_v39 }
 0xa39   :  { %2179 = vadd.xlane.f32.xlu0 %v2168_v24 }
 0xa4e   :  { %v2174_v46 = vpop.xlane.xlu0 %2173 }
 0xa4f   :  { %v2189_v13 = vmul.f32 0.088388346, %v2174_v46 }
 0xa55   :  { %v2098_v29 = vpop.f32.mrf.mxu0  ;;  %v2127_v59 = vpop.f32.mrf.mxu1 }
 0xa56   :  { %v2128_v31 = vadd.f32 %v2127_v59, %v3632_v9  ;;  %v2176_v45 = vpop.xlane.xlu1 %2175  ;;  %v3679_v34 = vadd.f32 %v2098_v29, %v3639_v52 }
 0xa57   :  { %v2190_v41 = vmul.f32 0.088388346, %v2176_v45 }
 0xa58   :  { %2842 = vtanh.f32 %v2128_v31 }
 0xa59   :  { %v2197_v53 = vmax.f32 %v2189_v13, %v2190_v41 }
 0xa5b   :  { %v2198_v54 = vrot.slane %v2197_v53, 4 }
 0xa5d   :  { %v2199_v16 = vmax.f32 %v2197_v53, %v2198_v54  ;;  %v2100_v27 = vpop.f32.mrf.mxu0  ;;  %v2129_v32 = vpop.f32.mrf.mxu1 }
 0xa5e   :  { %v2843_v33 = vpop.eup %2842  ;;  %v3682_v1 = vadd.f32 %v2100_v27, %v3639_v52  ;;  %v2130_v23 = vadd.f32 %v2129_v32, %v3632_v9 }
 0xa5f   :  { %v2200_v61 = vrot.slane %v2199_v16, 2  ;;  %v2169_v49 = vmul.f32 %v2843_v33, %v3644_v39 }
 0xa60   :  { %v2655_v2 = vpack.c.bf16 %v3682_v1, %v3679_v34  ;;  %2844 = vtanh.f32 %v2130_v23 }
 0xa61   :  { %v2201_v10 = vmax.f32 %v2199_v16, %v2200_v61  ;;  %2181 = vadd.xlane.f32.xlu1 %v2169_v49 }
 0xa62   :  { %2663 = vst [vmem:[#allocation11 + $0x10] sm:$0xff] %v2655_v2  }
 0xa63   :  { %v2202_v26 = vrot.slane %v2201_v10, 1 }
 0xa65   :  { %v2203_v4 = vmax.f32 %v2201_v10, %v2202_v26  ;;  %v2103_v17 = vpop.f32.mrf.mxu0  ;;  %v2132_v18 = vpop.f32.mrf.mxu1 }
 0xa66   :  { %v2845_v56 = vpop.eup %2844  ;;  %v2133_v44 = vadd.f32 %v2132_v18, %v3632_v9  ;;  %v3691_v25 = vadd.f32 %v2103_v17, %v3639_v52 }
 0xa67   :  { %v2225_v48 = vsub.f32 %v2189_v13, %v2203_v4  ;;  %v2226_v51 = vsub.f32 %v2190_v41, %v2203_v4  ;;  %v2170_v62 = vmul.f32 %v2845_v56, %v3644_v39 }
 0xa68   :  { %2846 = vtanh.f32 %v2133_v44 }
 0xa69   :  { %v2233_v21 = vmul.f32 1.442695, %v2225_v48  ;;  %v2235_v42 = vmul.f32 1.442695, %v2226_v51  ;;  %2183 = vadd.xlane.f32.xlu2 %v2170_v62 }
 0xa6b   :  { %2848 = vpow2.f32 %v2233_v21 }
 0xa6c   :  { %2850 = vpow2.f32 %v2235_v42 }
 0xa6d   :  { %v2105_v6 = vpop.f32.mrf.mxu0  ;;  %v2134_v5 = vpop.f32.mrf.mxu1 }
 0xa6e   :  { %v2847_v43 = vpop.eup %2846  ;;  %v3694_v0 = vadd.f32 %v2105_v6, %v3639_v52  ;;  %v2135_v38 = vadd.f32 %v2134_v5, %v3632_v9 }
 0xa6f   :  { %v2171_v60 = vmul.f32 %v2847_v43, %v3644_v39 }
 0xa70   :  { %v2660_v30 = vpack.c.bf16 %v3694_v0, %v3691_v25  ;;  %2852 = vtanh.f32 %v2135_v38 }
 0xa71   :  { %v2849_v36 = vpop.eup %2848  ;;  %2185 = vadd.xlane.f32.xlu0 %v2171_v60 }
 0xa72   :  { %v2851_v14 = vpop.eup %2850  ;;  %2664 = vst [vmem:[#allocation11 + $0x18] sm:$0xff] %v2660_v30  }
 0xa73   :  { %v2249_v28 = vadd.f32 %v2851_v14, %v2849_v36  ;;  %2341 = dma.vmem_to_hbm [thread:$0]  %s2334_s6, 512, %s2336_s18, [#allocation4], %s3053_s13, %s3053_s13, %s3054_s14  }
 0xa74   :  { %s2346_s13 = sshll.u32 %s3067_s7, 4  ;;  %s2347_s13 = int_to_ptr.vmem [resolvable:$true] %s2346_s13 }
 0xa75   :  { %v2250_v40 = vrot.slane %v2249_v28, 4 }
 0xa76   :  { %v2853_v50 = vpop.eup %2852 }
 0xa77   :  { %v2251_v12 = vadd.f32 %v2250_v40, %v2249_v28  ;;  %v2172_v20 = vmul.f32 %v2853_v50, %v3644_v39 }
 0xa79   :  { %v2252_v52 = vrot.slane %v2251_v12, 2  ;;  %2187 = vadd.xlane.f32.xlu1 %v2172_v20 }
 0xa7b   :  { %v2253_v35 = vadd.f32 %v2252_v52, %v2251_v12 }
 0xa7d   :  { %v2254_v9 = vrot.slane %v2253_v35, 1 }
 0xa7f   :  { %v2255_v19 = vadd.f32 %v2254_v9, %v2253_v35 }
 0xa81   :  { %2854 = vrcp.f32 %v2255_v19 }
 0xa87   :  { %v2855_v7 = vpop.eup %2854 }
 0xa88   :  { %v2281_v47 = vmul.f32 %v2855_v7, %v2849_v36  ;;  %v2282_v15 = vmul.f32 %v2855_v7, %v2851_v14 }
 0xa8a   :  { %v2289_v57 = vmul.f32 %v2281_v47, %v3649_v55  ;;  %v2290_v22 = vmul.f32 %v2282_v15, %v3652_v63 }
 0xa8c   :  { %v2297_v58 = vadd.f32 %v2290_v22, %v2289_v57 }
 0xa8e   :  { %v2298_v37 = vrot.slane %v2297_v58, 4 }
 0xa90   :  { %v2299_v8 = vadd.f32 %v2298_v37, %v2297_v58 }
 0xa92   :  { %v2300_v24 = vrot.slane %v2299_v8, 2 }
 0xa94   :  { %v2301_v46 = vadd.f32 %v2300_v24, %v2299_v8 }
 0xa96   :  { %v2302_v29 = vrot.slane %v2301_v46, 1 }
 0xa98   :  { %v2303_v39 = vadd.f32 %v2302_v29, %v2301_v46 }
 0xa9a   :  { %2325 = vst [vmem:[#allocation12] sm:$0x1] %v2303_v39 }
 0xaa4   :  { %v2178_v59 = vpop.xlane.xlu2 %2177 }
 0xaa5   :  { %v2191_v45 = vmul.f32 0.088388346, %v2178_v59 }
 0xaac   :  { %v2180_v31 = vpop.xlane.xlu0 %2179 }
 0xaad   :  { %v2192_v13 = vmul.f32 0.088388346, %v2180_v31 }
 0xaaf   :  { %v2204_v41 = vmax.f32 %v2191_v45, %v2192_v13 }
 0xab1   :  { %v2205_v55 = vrot.slane %v2204_v41, 4 }
 0xab3   :  { %v2206_v63 = vmax.f32 %v2204_v41, %v2205_v55 }
 0xab5   :  { %v2207_v53 = vrot.slane %v2206_v63, 2 }
 0xab7   :  { %v2208_v54 = vmax.f32 %v2206_v63, %v2207_v53 }
 0xab9   :  { %v2209_v16 = vrot.slane %v2208_v54, 1 }
 0xabb   :  { %v2210_v27 = vmax.f32 %v2208_v54, %v2209_v16 }
 0xabd   :  { %v2227_v32 = vsub.f32 %v2191_v45, %v2210_v27  ;;  %v2228_v33 = vsub.f32 %v2192_v13, %v2210_v27 }
 0xabf   :  { %v2237_v23 = vmul.f32 1.442695, %v2227_v32  ;;  %v2239_v61 = vmul.f32 1.442695, %v2228_v33 }
 0xac1   :  { %2856 = vpow2.f32 %v2237_v23 }
 0xac2   :  { %2858 = vpow2.f32 %v2239_v61 }
 0xac7   :  { %v2857_v49 = vpop.eup %2856 }
 0xac8   :  { %v2859_v2 = vpop.eup %2858 }
 0xac9   :  { %v2256_v10 = vadd.f32 %v2859_v2, %v2857_v49 }
 0xacb   :  { %v2257_v26 = vrot.slane %v2256_v10, 4 }
 0xacd   :  { %v2258_v4 = vadd.f32 %v2257_v26, %v2256_v10 }
 0xacf   :  { %v2259_v17 = vrot.slane %v2258_v4, 2 }
 0xad1   :  { %v2260_v18 = vadd.f32 %v2259_v17, %v2258_v4 }
 0xad3   :  { %v2261_v56 = vrot.slane %v2260_v18, 1 }
 0xad4   :  { %v2182_v48 = vpop.xlane.xlu1 %2181 }
 0xad5   :  { %v2262_v44 = vadd.f32 %v2261_v56, %v2260_v18  ;;  %v2193_v21 = vmul.f32 0.088388346, %v2182_v48 }
 0xad7   :  { %2860 = vrcp.f32 %v2262_v44 }
 0xadc   :  { %v2184_v51 = vpop.xlane.xlu2 %2183 }
 0xadd   :  { %v2861_v62 = vpop.eup %2860  ;;  %v2194_v42 = vmul.f32 0.088388346, %v2184_v51 }
 0xade   :  { %v2283_v6 = vmul.f32 %v2861_v62, %v2857_v49  ;;  %v2284_v5 = vmul.f32 %v2861_v62, %v2859_v2 }
 0xadf   :  { %v2211_v43 = vmax.f32 %v2193_v21, %v2194_v42 }
 0xae0   :  { %v2291_v38 = vmul.f32 %v2283_v6, %v3667_v11  ;;  %v2292_v60 = vmul.f32 %v2284_v5, %v3670_v3 }
 0xae1   :  { %v2212_v30 = vrot.slane %v2211_v43, 4 }
 0xae2   :  { %v2304_v36 = vadd.f32 %v2292_v60, %v2291_v38 }
 0xae3   :  { %v2213_v14 = vmax.f32 %v2211_v43, %v2212_v30 }
 0xae4   :  { %v2305_v28 = vrot.slane %v2304_v36, 4  ;;  %v2186_v9 = vpop.xlane.xlu0 %2185 }
 0xae5   :  { %v2214_v40 = vrot.slane %v2213_v14, 2  ;;  %v2195_v22 = vmul.f32 0.088388346, %v2186_v9 }
 0xae6   :  { %v2306_v50 = vadd.f32 %v2305_v28, %v2304_v36 }
 0xae7   :  { %v2215_v12 = vmax.f32 %v2213_v14, %v2214_v40 }
 0xae8   :  { %v2307_v20 = vrot.slane %v2306_v50, 2 }
 0xae9   :  { %v2216_v52 = vrot.slane %v2215_v12, 1 }
 0xaea   :  { %v2308_v35 = vadd.f32 %v2307_v20, %v2306_v50 }
 0xaeb   :  { %v2217_v19 = vmax.f32 %v2215_v12, %v2216_v52 }
 0xaec   :  { %v2309_v7 = vrot.slane %v2308_v35, 1  ;;  %v2188_v47 = vpop.xlane.xlu1 %2187 }
 0xaed   :  { %v2229_v15 = vsub.f32 %v2193_v21, %v2217_v19  ;;  %v2230_v57 = vsub.f32 %v2194_v42, %v2217_v19  ;;  %v2196_v11 = vmul.f32 0.088388346, %v2188_v47 }
 0xaee   :  { %v2310_v58 = vadd.f32 %v2309_v7, %v2308_v35 }
 0xaef   :  { %v2241_v3 = vmul.f32 1.442695, %v2229_v15  ;;  %v2243_v37 = vmul.f32 1.442695, %v2230_v57  ;;  %v2218_v8 = vmax.f32 %v2195_v22, %v2196_v11 }
 0xaf0   :  { %2326 = vst [vmem:[#allocation12 + $0x1] sm:$0x1] %v2310_v58 }
 0xaf1   :  { %2862 = vpow2.f32 %v2241_v3  ;;  %v2219_v24 = vrot.slane %v2218_v8, 4 }
 0xaf2   :  { %2864 = vpow2.f32 %v2243_v37 }
 0xaf3   :  { %v2220_v46 = vmax.f32 %v2218_v8, %v2219_v24 }
 0xaf5   :  { %v2221_v29 = vrot.slane %v2220_v46, 2 }
 0xaf7   :  { %v2863_v39 = vpop.eup %2862  ;;  %v2222_v59 = vmax.f32 %v2220_v46, %v2221_v29 }
 0xaf8   :  { %v2865_v31 = vpop.eup %2864 }
 0xaf9   :  { %v2263_v45 = vadd.f32 %v2865_v31, %v2863_v39  ;;  %v2223_v13 = vrot.slane %v2222_v59, 1 }
 0xafb   :  { %v2264_v41 = vrot.slane %v2263_v45, 4  ;;  %v2224_v55 = vmax.f32 %v2222_v59, %v2223_v13 }
 0xafd   :  { %v2265_v63 = vadd.f32 %v2264_v41, %v2263_v45  ;;  %v2231_v53 = vsub.f32 %v2195_v22, %v2224_v55  ;;  %v2232_v54 = vsub.f32 %v2196_v11, %v2224_v55 }
 0xaff   :  { %v2266_v16 = vrot.slane %v2265_v63, 2  ;;  %v2245_v27 = vmul.f32 1.442695, %v2231_v53  ;;  %v2247_v32 = vmul.f32 1.442695, %v2232_v54 }
 0xb01   :  { %v2267_v33 = vadd.f32 %v2266_v16, %v2265_v63  ;;  %2866 = vpow2.f32 %v2245_v27 }
 0xb02   :  { %2868 = vpow2.f32 %v2247_v32 }
 0xb03   :  { %v2268_v23 = vrot.slane %v2267_v33, 1 }
 0xb05   :  { %v2269_v61 = vadd.f32 %v2268_v23, %v2267_v33 }
 0xb07   :  { %v2867_v49 = vpop.eup %2866  ;;  %2870 = vrcp.f32 %v2269_v61 }
 0xb08   :  { %v2869_v2 = vpop.eup %2868 }
 0xb09   :  { %v2270_v10 = vadd.f32 %v2869_v2, %v2867_v49 }
 0xb0b   :  { %v2271_v26 = vrot.slane %v2270_v10, 4 }
 0xb0d   :  { %v2871_v4 = vpop.eup %2870  ;;  %v2272_v17 = vadd.f32 %v2271_v26, %v2270_v10 }
 0xb0e   :  { %v2285_v18 = vmul.f32 %v2871_v4, %v2863_v39  ;;  %v2286_v56 = vmul.f32 %v2871_v4, %v2865_v31 }
 0xb0f   :  { %v2273_v44 = vrot.slane %v2272_v17, 2 }
 0xb10   :  { %v2293_v48 = vmul.f32 %v2285_v18, %v3679_v34  ;;  %v2294_v51 = vmul.f32 %v2286_v56, %v3682_v1 }
 0xb11   :  { %v2274_v62 = vadd.f32 %v2273_v44, %v2272_v17 }
 0xb12   :  { %v2311_v21 = vadd.f32 %v2294_v51, %v2293_v48 }
 0xb13   :  { %v2275_v42 = vrot.slane %v2274_v62, 1 }
 0xb14   :  { %v2312_v6 = vrot.slane %v2311_v21, 4 }
 0xb15   :  { %v2276_v5 = vadd.f32 %v2275_v42, %v2274_v62 }
 0xb16   :  { %v2313_v43 = vadd.f32 %v2312_v6, %v2311_v21 }
 0xb17   :  { %2872 = vrcp.f32 %v2276_v5 }
 0xb18   :  { %v2314_v38 = vrot.slane %v2313_v43, 2 }
 0xb1a   :  { %v2315_v60 = vadd.f32 %v2314_v38, %v2313_v43 }
 0xb1c   :  { %v2316_v30 = vrot.slane %v2315_v60, 1 }
 0xb1d   :  { %v2873_v36 = vpop.eup %2872 }
 0xb1e   :  { %v2317_v14 = vadd.f32 %v2316_v30, %v2315_v60  ;;  %v2287_v28 = vmul.f32 %v2873_v36, %v2867_v49  ;;  %v2288_v40 = vmul.f32 %v2873_v36, %v2869_v2 }
 0xb20   :  { %2327 = vst [vmem:[#allocation12 + $0x2] sm:$0x1] %v2317_v14  ;;  %v2295_v50 = vmul.f32 %v2287_v28, %v3691_v25  ;;  %v2296_v34 = vmul.f32 %v2288_v40, %v3694_v0 }
 0xb22   :  { %v2318_v1 = vadd.f32 %v2296_v34, %v2295_v50 }
 0xb24   :  { %v2319_v12 = vrot.slane %v2318_v1, 4 }
 0xb26   :  { %v2320_v20 = vadd.f32 %v2319_v12, %v2318_v1 }
 0xb28   :  { %v2321_v52 = vrot.slane %v2320_v20, 2 }
 0xb2a   :  { %v2322_v35 = vadd.f32 %v2321_v52, %v2320_v20 }
 0xb2c   :  { %v2323_v9 = vrot.slane %v2322_v35, 1 }
 0xb2e   :  { %v2324_v19 = vadd.f32 %v2323_v9, %v2322_v35 }
 0xb30   :  { %2328 = vst [vmem:[#allocation12 + $0x3] sm:$0x1] %v2324_v19 }
 0xb31   :  { %2354 = dma.vmem_to_hbm [thread:$0]  %s2347_s13, 64, %s2349_s20, [#allocation13], %s3068_s3, %s3068_s3, %s3069_s21  }
 0xb32   :  { %3048 = dma.done.wait [#allocation4], 512  }
 0xb33   :  { %3049 = vsyncadd [#allocation4], 4294966784 }
 0xb34   :  { %3050 = dma.done.wait [#allocation13], 64  }
 0xb35   :  { %3051 = vsyncadd [#allocation13], 4294967232 }
 0xb36   :  { %2363 = vsyncpa [#allocation3], 1 }
 0xb37   :  { %2364 = vsyncpa [#allocation6], 1 }
 0xb38   :  { %2365 = vsyncpa [#allocation9], 1 }
 0xb39   :  { %2366 = vsyncpa [#allocation4], 1 }
 0xb3a   :  { %2367 = vsyncpa [#allocation13], 1 }

</bundles_post_ra>
